<compile_context>
chip_gen: v7x
topology: tpu7x:2x2x1
jax: 0.10.0
libtpu: 0.0.40
codegen_flags: <defaults>
</compile_context>

<pallas_src>
import numpy as np
import jax
import jax.numpy as jnp
from jax.experimental import pallas as pl
from jax.experimental.pallas import tpu as pltpu


def _round_up(v, m):
    return ((v + m - 1) // m) * m


def _cdiv(a, b):
    return -(-a // b)


def _to_batch_major(v):
    """(T, B, ...) -> (B, T, ...) relayout that never leaves VMEM."""
    if hasattr(pltpu, "einshape"):
        try:
            return pltpu.einshape("abc->bac", v)
        except Exception:  # signature drift on older builds
            pass
    # TODO(synk): fallback relies on Mosaic's generic transpose relayout.
    return jnp.swapaxes(v, 0, 1)


def _pick_block_n(n, t, row_bytes, fixed_bytes, vmem_budget):
    """Batch rows per grid step: multiple of 8, MXU-filling, VMEM-bounded."""
    # (a) first-matmul MXU rows: B*T >= 256 (v6e/v7x; v5e only needs 128).
    b = _round_up(max(1, _cdiv(256, max(t, 1))), 8)
    # (b) amortize the ~0.35us per-step pipeline cost: aim for <= ~8 grid steps.
    b = max(b, _round_up(_cdiv(n, 8), 8))
    # (c) shrink until double-buffered blocks + resident weights fit the budget.
    while b > 8 and fixed_bytes + b * row_bytes > vmem_budget:
        b -= 8
    # (d) keep >= 2 grid steps when the batch allows it (megacore / pipelining).
    while b > 8 and _cdiv(n, b) < 2:
        b -= 8
    # (e) never exceed the batch; a full-extent block is always layout-legal.
    return n if b >= n else b


def _make_divide_att_kernel(D, H, compute_dtype, approx_reciprocal):
    cdt = compute_dtype

    def kernel(x_ref, w1a_ref, w1b_ref, wp_ref, out_ref, attn_ref, flat_ref):
        T, B, _ = x_ref.shape  # (T, B, 2D) time-major block

        # Attention + bmm only depend on the batch block, not the D_out tile:
        # run them once (j == 0) and keep the flattened bmm in VMEM scratch.
        @pl.when(pl.program_id(1) == 0)
        def _():
            x = x_ref[...]                      # one HBM read of x per block
            xa = x[:, :, :D]                    # (T, B, D)  bmm lhs
            xb = x[:, :, D:]                    # (T, B, D)  attention input
            # TODO(synk): when D % 128 == 0, feed x as two lane-aligned
            # (T, B, D) blocks instead of slicing the lane axis here.

            # (1) w1: Linear(D,A) -> ReLU -> Linear(A,H) over all T*B rows.
            xb2 = xb.reshape(T * B, D).astype(cdt)
            h1 = jnp.dot(xb2, w1a_ref[...], preferred_element_type=jnp.float32)
            h1 = jnp.maximum(h1, 0.0).astype(cdt)
            logits = jnp.dot(h1, w1b_ref[...],
                             preferred_element_type=jnp.float32)
            logits = logits.reshape(T, B, H)    # (T, B, H), f32

            # (2) softmax over time (PyTorch dim 0); f32 VPU math, EUP recip.
            m = jnp.max(logits, axis=0, keepdims=True)
            e = jnp.exp(logits - m)
            denom = jnp.sum(e, axis=0, keepdims=True)               # (1, B, H)
            attn = e * pl.reciprocal(denom, approx=approx_reciprocal)

            # (3) single VMEM-only relayout to batch-major; reused for both
            # the lane-dense attn writeback and the bmm.
            attn_bt = _to_batch_major(attn)                         # (B, T, H)
            attn_ref[...] = attn_bt.reshape(B, T * H).astype(attn_ref.dtype)

            xa_bt = _to_batch_major(xa).astype(cdt)                 # (B, T, D)

            # (4) per-batch x_a^T @ attn with M = D on the MXU.
            bmm = jnp.einsum("btd,bth->bdh", xa_bt, attn_bt.astype(cdt),
                             preferred_element_type=jnp.float32)    # (B, D, H)

            # (5) flatten (d, h) -> d*H + h; this lines up with wp.T rows.
            flat_ref[...] = bmm.reshape(B, D * H).astype(flat_ref.dtype)

        # post_fc for the current D_out tile: (B, D*H) @ (D*H, tile_o).
        out = jnp.dot(flat_ref[...], wp_ref[...],
                      preferred_element_type=jnp.float32)
        out_ref[...] = out.astype(out_ref.dtype)

    return kernel


def divide_att_forward(x, w1a, w1b, wp, input_size, *, block_n=None,
                       compute_dtype=jnp.bfloat16, approx_reciprocal=True):
    """DivideAtt forward, 3-D path.

    x: (T, N, 2*input_size) time-major (exactly as PyTorch receives it)
    w1a: (A, D); w1b: (H, A); wp: (D_out, D*H)  -- PyTorch (out, in) layout.
    Returns (out, attn): out (N, D_out), attn (N, T, H).
    """
    T, N, two_d = x.shape
    D = input_size
    assert two_d == 2 * D
    A, D_in = w1a.shape
    assert D_in == D
    H, A2 = w1b.shape
    assert A2 == A
    D_out, DH = wp.shape
    assert DH == D * H

    # Weights in "x @ W" orientation, cast once to the MXU compute dtype.
    # wp.T rows are already in d*H + h order (matches the kernel flatten).
    w1a_t = jnp.transpose(w1a).astype(compute_dtype)        # (D, A)
    w1b_t = jnp.transpose(w1b).astype(compute_dtype)        # (A, H)
    wp_t = jnp.transpose(wp).astype(compute_dtype)          # (D*H, D_out)

    ebytes = jnp.dtype(x.dtype).itemsize
    obytes = ebytes
    cbytes = jnp.dtype(compute_dtype).itemsize

    # --- VMEM budget (v7x has only 64 MiB physical; v5e/v6e have 128) --------
    try:
        vmem_cap = int(pltpu.get_tpu_info().vmem_capacity_bytes)
    except Exception:
        vmem_cap = 64 * 1024 * 1024             # assume the smallest (v7x)
    vmem_budget = min(vmem_cap * 3 // 4, 100 * 1024 * 1024)

    # --- D_out tiling: keep the resident post_fc weight block bounded --------
    if D * H * D_out * cbytes <= vmem_budget // 4 or D_out <= 128:
        tile_o = D_out
    else:
        cols = max(128, ((vmem_budget // 4) // (D * H * cbytes)) // 128 * 128)
        tile_o = min(D_out, cols)
    n_out_tiles = _cdiv(D_out, tile_o)

    # --- batch tile: VMEM bookkeeping per batch row + resident weights -------
    row_bytes = (2 * T * 2 * D * ebytes          # x block (double-buffered)
                 + 2 * T * H * obytes            # attn block (double-buffered)
                 + 2 * tile_o * obytes           # out block (double-buffered)
                 + T * (A + 2 * H) * 4           # h1 / logits / attn (f32)
                 + T * (D + H) * cbytes          # batch-major copies
                 + D * H * (4 + 2 * cbytes))     # bmm + flatten + scratch
    weight_bytes = 2 * (D * A + A * H + D * H * tile_o) * cbytes

    if block_n is None:
        block_n = _pick_block_n(N, T, row_bytes, weight_bytes, vmem_budget)
    B = block_n
    assert B == N or B % 8 == 0, "block_n must be a multiple of 8 (or == N)"
    n_blocks = _cdiv(N, B)
    # Ragged tails are fine: padded batch rows only ever see their own garbage
    # (no cross-row reductions) and their outputs are dropped by Pallas.

    kernel = _make_divide_att_kernel(D, H, compute_dtype, approx_reciprocal)

    cost = pl.CostEstimate(
        flops=2 * N * T * (D * A + A * H + D * H) + 2 * N * D * H * D_out,
        transcendentals=N * T * H + N * H,
        bytes_accessed=(x.size * ebytes
                        + (w1a.size + w1b.size + wp.size) * cbytes
                        + (N * D_out + N * T * H) * obytes),
    )

    def build(single_buffer_weights):
        const_kw = ({"pipeline_mode": pl.Buffered(1)}
                    if single_buffer_weights else {})
        # Only single-buffer wp when it is not tiled over D_out (constant map).
        wp_kw = const_kw if n_out_tiles == 1 else {}
        grid_spec = pltpu.PrefetchScalarGridSpec(
            num_scalar_prefetch=0,
            grid=(n_blocks, n_out_tiles),
            in_specs=[
                # x: time-major block; N is tiled directly here, so no wrapper
                # transpose / pad of x is ever materialized in HBM.  The block
                # index ignores j, so x is fetched once per batch block.
                pl.BlockSpec((T, B, 2 * D), lambda n, j: (0, n, 0)),
                pl.BlockSpec((D, A), lambda n, j: (0, 0), **const_kw),
                pl.BlockSpec((A, H), lambda n, j: (0, 0), **const_kw),
                pl.BlockSpec((D * H, tile_o), lambda n, j: (0, j), **wp_kw),
            ],
            out_specs=[
                pl.BlockSpec((B, tile_o), lambda n, j: (n, j)),
                # Lane-dense attn writeback (last dim T*H instead of H).
                pl.BlockSpec((B, T * H), lambda n, j: (n, 0)),
            ],
            scratch_shapes=[pltpu.VMEM((B, D * H), compute_dtype)],
        )
        return pl.pallas_call(
            kernel,
            out_shape=(jax.ShapeDtypeStruct((N, D_out), x.dtype),
                       jax.ShapeDtypeStruct((N, T * H), x.dtype)),
            grid_spec=grid_spec,
            compiler_params=pltpu.CompilerParams(
                dimension_semantics=("parallel", "arbitrary"),
                vmem_limit_bytes=int(vmem_budget),
            ),
            cost_estimate=cost,
        )

    try:
        out, attn_flat = build(True)(x, w1a_t, w1b_t, wp_t)
    except Exception:
        # Fallback for JAX builds without BlockSpec.pipeline_mode support;
        # only costs extra (double-buffered) weight VMEM.
        out, attn_flat = build(False)(x, w1a_t, w1b_t, wp_t)

    return out, attn_flat.reshape(N, T, H)


def divide_att_reference(x, w1a, w1b, wp, input_size):
    """Pure-JAX reference mirroring the PyTorch 3-D forward path."""
    D = input_size
    x_a = x[:, :, :D]                                   # (T, N, D)
    x_b = x[:, :, D:]                                   # (T, N, D)
    h = jnp.maximum(jnp.einsum('tnd,ad->tna', x_b, w1a), 0.0)
    logits = jnp.einsum('tna,ha->tnh', h, w1b)          # (T, N, H)
    attn = jax.nn.softmax(logits, axis=0)
    attn_t = jnp.transpose(attn, (1, 0, 2))             # (N, T, H)
    xa_t = jnp.transpose(x_a, (1, 2, 0))                # (N, D, T)
    bmm = jnp.einsum('ndt,nth->ndh', xa_t, attn_t)      # (N, D, H)
    flat = bmm.reshape(bmm.shape[0], -1)                # (N, D*H)
    out = flat @ wp.T                                   # (N, D_out)
    return out, attn_t


if __name__ == "__main__":
    # Small deterministic shapes: seq T=8, batch N=16, input_size D=16,
    # attention_dim A=32, attention_head_num H=4.  x last dim = 2*D = 32.
    T, N, D, A, H = 8, 16, 16, 32, 4

    key = jax.random.PRNGKey(0)
    kx, k1, k2, k3 = jax.random.split(key, 4)

    x = jax.random.normal(kx, (T, N, 2 * D), dtype=jnp.float32)
    # PyTorch Linear weight shapes: (out_features, in_features), no biases.
    w1a = jax.random.normal(k1, (A, D), dtype=jnp.float32) * (1.0 / np.sqrt(D))
    w1b = jax.random.normal(k2, (H, A), dtype=jnp.float32) * (1.0 / np.sqrt(A))
    wp = jax.random.normal(k3, (D, D * H), dtype=jnp.float32) * (1.0 / np.sqrt(D * H))

    out_ref, attn_ref = divide_att_reference(x, w1a, w1b, wp, input_size=D)

    # 1) Exact-math run (f32 MXU operands, exact reciprocal): validates the
    #    new time-major / lane-dense structure tightly.
    out32, attn32 = divide_att_forward(x, w1a, w1b, wp, input_size=D,
                                       compute_dtype=jnp.float32,
                                       approx_reciprocal=False)
    out32 = jax.block_until_ready(out32)
    attn32 = jax.block_until_ready(attn32)
    np.testing.assert_allclose(np.asarray(out32), np.asarray(out_ref),
                               rtol=1e-5, atol=1e-5)
    np.testing.assert_allclose(np.asarray(attn32), np.asarray(attn_ref),
                               rtol=1e-5, atol=1e-5)

    # 2) Optimized run (bf16 MXU operands + EUP reciprocal): the production
    #    config recommended by the perf review; looser tolerances for bf16.
    out, attn = divide_att_forward(x, w1a, w1b, wp, input_size=D)
    out = jax.block_until_ready(out)
    attn = jax.block_until_ready(attn)
    np.testing.assert_allclose(np.asarray(out), np.asarray(out_ref),
                               rtol=3e-2, atol=3e-2)
    np.testing.assert_allclose(np.asarray(attn), np.asarray(attn_ref),
                               rtol=3e-2, atol=3e-2)

    # TODO(synk): the 2-D (single-matrix) branch of DivideAtt.forward is not
    # implemented; only the 3-D (T, N, 2*input_size) path is covered.
    print("KERNEL_OK")
</pallas_src>

<mosaic_0001>
module attributes {stable_mosaic.version = 11 : i64} {
  func.func @kernel(%arg0: i32, %arg1: i32, %arg2: memref<8x8x32xf32, #tpu.memory_space<vmem>>, %arg3: memref<16x32xf32, #tpu.memory_space<vmem>>, %arg4: memref<32x4xf32, #tpu.memory_space<vmem>>, %arg5: memref<64x16xf32, #tpu.memory_space<vmem>>, %arg6: memref<8x16xf32, #tpu.memory_space<vmem>>, %arg7: memref<8x32xf32, #tpu.memory_space<vmem>>, %arg8: memref<8x64xf32, #tpu.memory_space<vmem>>) attributes {dimension_semantics = [#tpu.dimension_semantics<parallel>, #tpu.dimension_semantics<arbitrary>], iteration_bounds = array<i64: 2, 1>, scalar_prefetch = 0 : i64, scratch_operands = 1 : i64, tpu.core_type = #tpu.core_type<tc>, window_params = [{transform_indices = @transform_0, window_bounds = array<i64: 8, 8, 32>}, {pipeline_mode = #tpu.pipeline_mode<synchronous>, transform_indices = @transform_1, window_bounds = array<i64: 16, 32>}, {pipeline_mode = #tpu.pipeline_mode<synchronous>, transform_indices = @transform_2, window_bounds = array<i64: 32, 4>}, {pipeline_mode = #tpu.pipeline_mode<synchronous>, transform_indices = @transform_3, window_bounds = array<i64: 64, 16>}, {transform_indices = @transform_4, window_bounds = array<i64: 8, 16>}, {transform_indices = @transform_5, window_bounds = array<i64: 8, 32>}]} {
    %c0_i32 = arith.constant 0 : i32
    %0 = arith.cmpi eq, %arg1, %c0_i32 : i32
    %1 = arith.extui %0 : i1 to i32
    %c0_i32_0 = arith.constant 0 : i32
    %2 = arith.cmpi ne, %1, %c0_i32_0 : i32
    scf.if %2 {
      %c0_6 = arith.constant 0 : index
      %c0_7 = arith.constant 0 : index
      %c0_8 = arith.constant 0 : index
      %7 = vector.load %arg2[%c0_6, %c0_7, %c0_8] : memref<8x8x32xf32, #tpu.memory_space<vmem>>, vector<8x8x32xf32>
      %8 = vector.extract_strided_slice %7 {offsets = [0, 0, 0], sizes = [8, 8, 16], strides = [1, 1, 1]} : vector<8x8x32xf32> to vector<8x8x16xf32>
      %9 = vector.extract_strided_slice %7 {offsets = [0, 0, 16], sizes = [8, 8, 16], strides = [1, 1, 1]} : vector<8x8x32xf32> to vector<8x8x16xf32>
      %10 = vector.shape_cast %9 : vector<8x8x16xf32> to vector<64x16xf32>
      %c0_9 = arith.constant 0 : index
      %c0_10 = arith.constant 0 : index
      %11 = vector.load %arg3[%c0_9, %c0_10] : memref<16x32xf32, #tpu.memory_space<vmem>>, vector<16x32xf32>
      %cst_11 = arith.constant dense<0.000000e+00> : vector<64x32xf32>
      %12 = tpu.matmul %10, %11, %cst_11 {dimension_numbers = #tpu.dot_dimension_numbers<[1], [0], [0], [1], [0, 0, 1, 1], [], []>} : vector<64x16xf32>, vector<16x32xf32>, vector<64x32xf32> -> vector<64x32xf32>
      %cst_12 = arith.constant 0.000000e+00 : f32
      %13 = vector.broadcast %cst_12 : f32 to vector<64x32xf32>
      %14 = arith.maximumf %12, %13 : vector<64x32xf32>
      %c0_13 = arith.constant 0 : index
      %c0_14 = arith.constant 0 : index
      %15 = vector.load %arg4[%c0_13, %c0_14] : memref<32x4xf32, #tpu.memory_space<vmem>>, vector<32x4xf32>
      %cst_15 = arith.constant dense<0.000000e+00> : vector<64x4xf32>
      %16 = tpu.matmul %14, %15, %cst_15 {dimension_numbers = #tpu.dot_dimension_numbers<[1], [0], [0], [1], [0, 0, 1, 1], [], []>} : vector<64x32xf32>, vector<32x4xf32>, vector<64x4xf32> -> vector<64x4xf32>
      %17 = vector.shape_cast %16 : vector<64x4xf32> to vector<8x8x4xf32>
      %cst_16 = arith.constant dense<0xFF800000> : vector<8x4xf32>
      %18 = vector.multi_reduction <maximumf>, %17, %cst_16 [0] : vector<8x8x4xf32> to vector<8x4xf32>
      %19 = vector.shape_cast %18 : vector<8x4xf32> to vector<1x8x4xf32>
      %20 = vector.broadcast %19 : vector<1x8x4xf32> to vector<8x8x4xf32>
      %21 = arith.subf %17, %20 : vector<8x8x4xf32>
      %22 = math.exp %21 : vector<8x8x4xf32>
      %cst_17 = arith.constant dense<0.000000e+00> : vector<8x4xf32>
      %23 = vector.multi_reduction <add>, %22, %cst_17 [0] : vector<8x8x4xf32> to vector<8x4xf32>
      %24 = vector.shape_cast %23 : vector<8x4xf32> to vector<1x8x4xf32>
      %25 = tpu.reciprocal %24 : vector<1x8x4xf32> -> vector<1x8x4xf32>
      %26 = vector.broadcast %25 : vector<1x8x4xf32> to vector<8x8x4xf32>
      %27 = arith.mulf %22, %26 : vector<8x8x4xf32>
      %28 = tpu.transpose %27, [1, 0, 2] : vector<8x8x4xf32> -> vector<8x8x4xf32>
      %29 = vector.shape_cast %28 : vector<8x8x4xf32> to vector<8x32xf32>
      %c0_18 = arith.constant 0 : index
      %c0_19 = arith.constant 0 : index
      %30 = vector.load %arg7[%c0_18, %c0_19] : memref<8x32xf32, #tpu.memory_space<vmem>>, vector<8x32xf32>
      tpu.vector_store %arg7[%c0_18, %c0_19], %29 {strides = array<i32>} : memref<8x32xf32, #tpu.memory_space<vmem>>, vector<8x32xf32>,
      %31 = tpu.transpose %8, [1, 0, 2] : vector<8x8x16xf32> -> vector<8x8x16xf32>
      "tpu.trace_start"() <{level = 10 : i32, message = "btd,bth->bdh"}> : () -> ()
      %cst_20 = arith.constant dense<0.000000e+00> : vector<8x16x4xf32>
      %32 = tpu.matmul %31, %28, %cst_20 {dimension_numbers = #tpu.dot_dimension_numbers<[1], [1], [2], [2], [0, 0, 0, 2, 1, 2], [0], [0]>} : vector<8x8x16xf32>, vector<8x8x4xf32>, vector<8x16x4xf32> -> vector<8x16x4xf32>
      "tpu.trace_stop"() : () -> ()
      %33 = vector.shape_cast %32 : vector<8x16x4xf32> to vector<8x64xf32>
      %c0_21 = arith.constant 0 : index
      %c0_22 = arith.constant 0 : index
      %34 = vector.load %arg8[%c0_21, %c0_22] : memref<8x64xf32, #tpu.memory_space<vmem>>, vector<8x64xf32>
      tpu.vector_store %arg8[%c0_21, %c0_22], %33 {strides = array<i32>} : memref<8x64xf32, #tpu.memory_space<vmem>>, vector<8x64xf32>,
    } else {
    }
    %c0 = arith.constant 0 : index
    %c0_1 = arith.constant 0 : index
    %3 = vector.load %arg8[%c0, %c0_1] : memref<8x64xf32, #tpu.memory_space<vmem>>, vector<8x64xf32>
    %c0_2 = arith.constant 0 : index
    %c0_3 = arith.constant 0 : index
    %4 = vector.load %arg5[%c0_2, %c0_3] : memref<64x16xf32, #tpu.memory_space<vmem>>, vector<64x16xf32>
    %cst = arith.constant dense<0.000000e+00> : vector<8x16xf32>
    %5 = tpu.matmul %3, %4, %cst {dimension_numbers = #tpu.dot_dimension_numbers<[1], [0], [0], [1], [0, 0, 1, 1], [], []>} : vector<8x64xf32>, vector<64x16xf32>, vector<8x16xf32> -> vector<8x16xf32>
    %c0_4 = arith.constant 0 : index
    %c0_5 = arith.constant 0 : index
    %6 = vector.load %arg6[%c0_4, %c0_5] : memref<8x16xf32, #tpu.memory_space<vmem>>, vector<8x16xf32>
    tpu.vector_store %arg6[%c0_4, %c0_5], %5 {strides = array<i32>} : memref<8x16xf32, #tpu.memory_space<vmem>>, vector<8x16xf32>,
    return
  }
  func.func @transform_0(%arg0: i32, %arg1: i32) -> (i32, i32, i32) {
    %c0_i32 = arith.constant 0 : i32
    %c0_i32_0 = arith.constant 0 : i32
    %c0_i32_1 = arith.constant 0 : i32
    return %c0_i32, %arg0, %c0_i32_0 : i32, i32, i32
  }
  func.func @transform_1(%arg0: i32, %arg1: i32) -> (i32, i32) {
    %c0_i32 = arith.constant 0 : i32
    %c0_i32_0 = arith.constant 0 : i32
    %c0_i32_1 = arith.constant 0 : i32
    return %c0_i32, %c0_i32_0 : i32, i32
  }
  func.func @transform_2(%arg0: i32, %arg1: i32) -> (i32, i32) {
    %c0_i32 = arith.constant 0 : i32
    %c0_i32_0 = arith.constant 0 : i32
    %c0_i32_1 = arith.constant 0 : i32
    return %c0_i32, %c0_i32_0 : i32, i32
  }
  func.func @transform_3(%arg0: i32, %arg1: i32) -> (i32, i32) {
    %c0_i32 = arith.constant 0 : i32
    %c0_i32_0 = arith.constant 0 : i32
    return %c0_i32, %arg1 : i32, i32
  }
  func.func @transform_4(%arg0: i32, %arg1: i32) -> (i32, i32) {
    %c0_i32 = arith.constant 0 : i32
    return %arg0, %arg1 : i32, i32
  }
  func.func @transform_5(%arg0: i32, %arg1: i32) -> (i32, i32) {
    %c0_i32 = arith.constant 0 : i32
    %c0_i32_0 = arith.constant 0 : i32
    return %arg0, %c0_i32 : i32, i32
  }
}

module attributes {stable_mosaic.version = 11 : i64} {
  func.func @kernel(%arg0: i32, %arg1: i32, %arg2: memref<8x8x32xf32, #tpu.memory_space<vmem>>, %arg3: memref<16x32xf32, #tpu.memory_space<vmem>>, %arg4: memref<32x4xf32, #tpu.memory_space<vmem>>, %arg5: memref<64x16xf32, #tpu.memory_space<vmem>>, %arg6: memref<8x16xf32, #tpu.memory_space<vmem>>, %arg7: memref<8x32xf32, #tpu.memory_space<vmem>>, %arg8: memref<8x64xf32, #tpu.memory_space<vmem>>) attributes {dimension_semantics = [#tpu.dimension_semantics<parallel>, #tpu.dimension_semantics<arbitrary>], iteration_bounds = array<i64: 2, 1>, scalar_prefetch = 0 : i64, scratch_operands = 1 : i64, tpu.core_type = #tpu.core_type<tc>, window_params = [{transform_indices = @transform_0, window_bounds = array<i64: 8, 8, 32>}, {pipeline_mode = #tpu.pipeline_mode<synchronous>, transform_indices = @transform_1, window_bounds = array<i64: 16, 32>}, {pipeline_mode = #tpu.pipeline_mode<synchronous>, transform_indices = @transform_2, window_bounds = array<i64: 32, 4>}, {transform_indices = @transform_3, window_bounds = array<i64: 64, 16>}, {transform_indices = @transform_4, window_bounds = array<i64: 8, 16>}, {transform_indices = @transform_5, window_bounds = array<i64: 8, 32>}]} {
    %c0_i32 = arith.constant 0 : i32
    %0 = arith.cmpi eq, %arg1, %c0_i32 : i32
    %1 = arith.extui %0 : i1 to i32
    %c0_i32_0 = arith.constant 0 : i32
    %2 = arith.cmpi ne, %1, %c0_i32_0 : i32
    scf.if %2 {
      %c0_6 = arith.constant 0 : index
      %c0_7 = arith.constant 0 : index
      %c0_8 = arith.constant 0 : index
      %7 = vector.load %arg2[%c0_6, %c0_7, %c0_8] : memref<8x8x32xf32, #tpu.memory_space<vmem>>, vector<8x8x32xf32>
      %8 = vector.extract_strided_slice %7 {offsets = [0, 0, 0], sizes = [8, 8, 16], strides = [1, 1, 1]} : vector<8x8x32xf32> to vector<8x8x16xf32>
      %9 = vector.extract_strided_slice %7 {offsets = [0, 0, 16], sizes = [8, 8, 16], strides = [1, 1, 1]} : vector<8x8x32xf32> to vector<8x8x16xf32>
      %10 = vector.shape_cast %9 : vector<8x8x16xf32> to vector<64x16xf32>
      %c0_9 = arith.constant 0 : index
      %c0_10 = arith.constant 0 : index
      %11 = vector.load %arg3[%c0_9, %c0_10] : memref<16x32xf32, #tpu.memory_space<vmem>>, vector<16x32xf32>
      %cst_11 = arith.constant dense<0.000000e+00> : vector<64x32xf32>
      %12 = tpu.matmul %10, %11, %cst_11 {dimension_numbers = #tpu.dot_dimension_numbers<[1], [0], [0], [1], [0, 0, 1, 1], [], []>} : vector<64x16xf32>, vector<16x32xf32>, vector<64x32xf32> -> vector<64x32xf32>
      %cst_12 = arith.constant 0.000000e+00 : f32
      %13 = vector.broadcast %cst_12 : f32 to vector<64x32xf32>
      %14 = arith.maximumf %12, %13 : vector<64x32xf32>
      %c0_13 = arith.constant 0 : index
      %c0_14 = arith.constant 0 : index
      %15 = vector.load %arg4[%c0_13, %c0_14] : memref<32x4xf32, #tpu.memory_space<vmem>>, vector<32x4xf32>
      %cst_15 = arith.constant dense<0.000000e+00> : vector<64x4xf32>
      %16 = tpu.matmul %14, %15, %cst_15 {dimension_numbers = #tpu.dot_dimension_numbers<[1], [0], [0], [1], [0, 0, 1, 1], [], []>} : vector<64x32xf32>, vector<32x4xf32>, vector<64x4xf32> -> vector<64x4xf32>
      %17 = vector.shape_cast %16 : vector<64x4xf32> to vector<8x8x4xf32>
      %cst_16 = arith.constant dense<0xFF800000> : vector<8x4xf32>
      %18 = vector.multi_reduction <maximumf>, %17, %cst_16 [0] : vector<8x8x4xf32> to vector<8x4xf32>
      %19 = vector.shape_cast %18 : vector<8x4xf32> to vector<1x8x4xf32>
      %20 = vector.broadcast %19 : vector<1x8x4xf32> to vector<8x8x4xf32>
      %21 = arith.subf %17, %20 : vector<8x8x4xf32>
      %22 = math.exp %21 : vector<8x8x4xf32>
      %cst_17 = arith.constant dense<0.000000e+00> : vector<8x4xf32>
      %23 = vector.multi_reduction <add>, %22, %cst_17 [0] : vector<8x8x4xf32> to vector<8x4xf32>
      %24 = vector.shape_cast %23 : vector<8x4xf32> to vector<1x8x4xf32>
      %25 = tpu.reciprocal %24 : vector<1x8x4xf32> -> vector<1x8x4xf32>
      %26 = vector.broadcast %25 : vector<1x8x4xf32> to vector<8x8x4xf32>
      %27 = arith.mulf %22, %26 : vector<8x8x4xf32>
      %28 = tpu.transpose %27, [1, 0, 2] : vector<8x8x4xf32> -> vector<8x8x4xf32>
      %29 = vector.shape_cast %28 : vector<8x8x4xf32> to vector<8x32xf32>
      %c0_18 = arith.constant 0 : index
      %c0_19 = arith.constant 0 : index
      %30 = vector.load %arg7[%c0_18, %c0_19] : memref<8x32xf32, #tpu.memory_space<vmem>>, vector<8x32xf32>
      tpu.vector_store %arg7[%c0_18, %c0_19], %29 {strides = array<i32>} : memref<8x32xf32, #tpu.memory_space<vmem>>, vector<8x32xf32>,
      %31 = tpu.transpose %8, [1, 0, 2] : vector<8x8x16xf32> -> vector<8x8x16xf32>
      "tpu.trace_start"() <{level = 10 : i32, message = "btd,bth->bdh"}> : () -> ()
      %cst_20 = arith.constant dense<0.000000e+00> : vector<8x16x4xf32>
      %32 = tpu.matmul %31, %28, %cst_20 {dimension_numbers = #tpu.dot_dimension_numbers<[1], [1], [2], [2], [0, 0, 0, 2, 1, 2], [0], [0]>} : vector<8x8x16xf32>, vector<8x8x4xf32>, vector<8x16x4xf32> -> vector<8x16x4xf32>
      "tpu.trace_stop"() : () -> ()
      %33 = vector.shape_cast %32 : vector<8x16x4xf32> to vector<8x64xf32>
      %c0_21 = arith.constant 0 : index
      %c0_22 = arith.constant 0 : index
      %34 = vector.load %arg8[%c0_21, %c0_22] : memref<8x64xf32, #tpu.memory_space<vmem>>, vector<8x64xf32>
      tpu.vector_store %arg8[%c0_21, %c0_22], %33 {strides = array<i32>} : memref<8x64xf32, #tpu.memory_space<vmem>>, vector<8x64xf32>,
    } else {
    }
    %c0 = arith.constant 0 : index
    %c0_1 = arith.constant 0 : index
    %3 = vector.load %arg8[%c0, %c0_1] : memref<8x64xf32, #tpu.memory_space<vmem>>, vector<8x64xf32>
    %c0_2 = arith.constant 0 : index
    %c0_3 = arith.constant 0 : index
    %4 = vector.load %arg5[%c0_2, %c0_3] : memref<64x16xf32, #tpu.memory_space<vmem>>, vector<64x16xf32>
    %cst = arith.constant dense<0.000000e+00> : vector<8x16xf32>
    %5 = tpu.matmul %3, %4, %cst {dimension_numbers = #tpu.dot_dimension_numbers<[1], [0], [0], [1], [0, 0, 1, 1], [], []>} : vector<8x64xf32>, vector<64x16xf32>, vector<8x16xf32> -> vector<8x16xf32>
    %c0_4 = arith.constant 0 : index
    %c0_5 = arith.constant 0 : index
    %6 = vector.load %arg6[%c0_4, %c0_5] : memref<8x16xf32, #tpu.memory_space<vmem>>, vector<8x16xf32>
    tpu.vector_store %arg6[%c0_4, %c0_5], %5 {strides = array<i32>} : memref<8x16xf32, #tpu.memory_space<vmem>>, vector<8x16xf32>,
    return
  }
  func.func @transform_0(%arg0: i32, %arg1: i32) -> (i32, i32, i32) {
    %c0_i32 = arith.constant 0 : i32
    %c0_i32_0 = arith.constant 0 : i32
    %c0_i32_1 = arith.constant 0 : i32
    return %c0_i32, %arg0, %c0_i32_0 : i32, i32, i32
  }
  func.func @transform_1(%arg0: i32, %arg1: i32) -> (i32, i32) {
    %c0_i32 = arith.constant 0 : i32
    %c0_i32_0 = arith.constant 0 : i32
    %c0_i32_1 = arith.constant 0 : i32
    return %c0_i32, %c0_i32_0 : i32, i32
  }
  func.func @transform_2(%arg0: i32, %arg1: i32) -> (i32, i32) {
    %c0_i32 = arith.constant 0 : i32
    %c0_i32_0 = arith.constant 0 : i32
    %c0_i32_1 = arith.constant 0 : i32
    return %c0_i32, %c0_i32_0 : i32, i32
  }
  func.func @transform_3(%arg0: i32, %arg1: i32) -> (i32, i32) {
    %c0_i32 = arith.constant 0 : i32
    %c0_i32_0 = arith.constant 0 : i32
    return %c0_i32, %arg1 : i32, i32
  }
  func.func @transform_4(%arg0: i32, %arg1: i32) -> (i32, i32) {
    %c0_i32 = arith.constant 0 : i32
    return %arg0, %arg1 : i32, i32
  }
  func.func @transform_5(%arg0: i32, %arg1: i32) -> (i32, i32) {
    %c0_i32 = arith.constant 0 : i32
    %c0_i32_0 = arith.constant 0 : i32
    return %arg0, %c0_i32 : i32, i32
  }
}

</mosaic_0001>

<bundles_post_ra>
// kernel: tpu_custom_call.1
= control target key start
LH: loop header
LB: loop body
LE: loop exit
PB: predicated region body
PF: predicated region fallthrough
CT: control target
= control target key end

     0   :  { %11 = vsyncpa [#allocation4], 0  ;;  %s3727_s0 = inlined_call_operand.hbm [shape: f32[8,16,32], index: 0, kind: input, shape index: {}]   ;;  %s3728_s1 = inlined_call_operand.vmem [shape: f32[16,32], index: 1, kind: input, shape index: {}]   ;;  %s3729_s2 = inlined_call_operand.vmem [shape: f32[32,4], index: 2, kind: input, shape index: {}]   ;;  %s3730_s3 = inlined_call_operand.vmem [shape: f32[64,16], index: 3, kind: input, shape index: {}]   ;;  %s3731_s4 = inlined_call_operand.hbm [shape: f32[16,16], index: 4, kind: output, shape index: {0}]   ;;  %s3732_s5 = inlined_call_operand.hbm [shape: f32[16,32], index: 5, kind: output, shape index: {1}]  }
   0x1   :  { %13 = vsyncpa [#allocation4 + $0x1], 0 }
   0x2   :  { %14 = vsyncpa [#allocation5], 0 }
   0x3   :  { %16 = vsyncpa [#allocation5 + $0x1], 0 }
   0x4   :  { %17 = vsyncpa [#allocation8], 0 }
   0x5   :  { %19 = vsyncpa [#allocation8 + $0x1], 0  ;;  %s3159_s18 = smov 0   ;;  %s3161_s19 = smov 0  }
   0x6   :  { %s3163_s20 = smov 0   ;;  %s3165_s21 = smov 0  }
   0x7   :  { %s3167_s22 = smov 0   ;;  %s3169_s23 = smov 0  }
   0x8 LB: > { %s2603_s24 = sadd.s32 4294967295, %s3100_s23   ;;  %s2604_s25 = sadd.s32 4294967294, %s3100_s23   ;;  %s3100_s23 = sphi %s3169_s23, %s25_s23   ;;  %s3096_s22 = sphi %s3167_s22, %s3748_s22   ;;  %s3092_s21 = sphi %s3165_s21, %s3747_s21   ;;  %s3088_s20 = sphi %s3163_s20, %s3746_s20   ;;  %s3084_s19 = sphi %s3161_s19, %s3745_s19   ;;  %s3080_s18 = sphi %s3159_s18, %s3744_s18  }
   0x9   : > { %s37_s26 = sadd.s32 1, %s3096_s22  ;;  %s44_s27 = sadd.s32 1, %s3088_s20 }
   0xa   : > { %p39_p0 = scmp.ge.s32.totalorder %s37_s26, 2  ;;  %p51_p1 = scmp.ne.s32.totalorder %s3088_s20, %s3084_s19 }
   0xb   : > { %p52_p2 = scmp.eq.s32.totalorder %s3100_s23, 0  ;;  %p57_p3 = scmp.ne.s32.totalorder %s3084_s19, %s3080_s18 }
   0xc   : > { %s3750_s26 = smov (%p39_p0, %s37_s26), 0  ;;  %p58_p5 = scmp.eq.s32.totalorder %s2603_s24, 0 }
   0xd   : > { %p3200_p4 = por %p52_p2, %p51_p1  ;;  %s41_s29 = ssub.s32 %s3096_s22, %s3750_s26 }
   0xe   : > { %p151_p6 = scmp.eq.s32.totalorder %s2603_s24, 1  ;;  %p42_p7 = scmp.eq.s32.totalorder %s41_s29, 0 }
   0xf   : > { %p3206_p8 = por %p58_p5, %p57_p3  ;;  %p157_p10 = scmp.eq.s32.totalorder %s2604_s25, 1 }
  0x10   : > { %p3210_p9 = por %p151_p6, %p51_p1  ;;  %p2856_p13 = scmp.lt.s32.totalorder %s3100_s23, 2 }
  0x11   : > { %s3215_s7 = scalar_select %p42_p7, %s3088_s20, %s44_s27  }
  0x12   : > { %s3737_s6 = scalar_select %p3210_p9, 1, 0 }
  0x13   : > { %p3217_p11 = por %p157_p10, %p57_p3  ;;  %s216_s9 = sand.u32 1, %s3088_s20  }
  0x14   : > { %s2608_s10 = sshll.u32 %s216_s9, 6  ;;  %s2609_s11 = sshll.u32 %s3096_s22, 7 }
  0x15   : > { %s3738_s8 = scalar_select %p3217_p11, 1, 0 }
  0x16   : > { %s3228_s14 = scalar_lea.hbm %s3727_s0, %s2609_s11  ;;  %s220_s15 = scalar_lea.vmem [#allocation3], %s2608_s10 }
  0x17   : > { %s226_s16 = sshll.u32 %s220_s15, 4  ;;  %p3234_p0 = pnand %p2856_p13, %p3200_p4  ;;  %s3230_s16 = int_to_ptr.vmem [resolvable:$true] %s226_s16 }
  0x18   : > { %s3238_s24 = scalar_lea.sflag [#allocation4], %s216_s9  ;;  %s2956_s25 = scalar_lea.hbm %s3228_s14, 1024 }
  0x19   : > { %p2957_p1 = scmp.ne.s32.totalorder %s3228_s14, %s2956_s25  ;;  %p2958_p2 = pneg %p3234_p0 }
  0x1a   : > { %s2961_s28 = scalar_lea.hbm %s3727_s0, 2048  ;;  %p2962_p4 = scmp.lt.u32.totalorder %s3228_s14, %s3727_s0 }
  0x1b   : > { %p2959_p3 = pnand %p2958_p2, %p2957_p1  ;;  %p2963_p6 = scmp.lt.u32.totalorder %s2961_s28, %s2956_s25 }
  0x1c   : > { %p2965_p10 = scmp.lt.u32.totalorder %s2956_s25, %s3228_s14 }
  0x1d   : > { %p2960_p5 = pneg %p2959_p3  ;;  %p2964_p7 = por %p2963_p6, %p2962_p4 }
  0x1f   : > { %p2966_p13 = por %p2965_p10, %p2964_p7 }
  0x21   : > { %p2967_p12 = pnand %p2966_p13, %p2960_p5 }
  0x23   : > { %2970 = shalt.err (!%p2967_p12)
}
  0x24   : > { %s2971_s9 = scalar_lea.vmem %s3230_s16, 1024  ;;  %s3102_s12 = smov [#allocation3]  }
  0x25   : > { %p2972_p1 = scmp.ne.s32.totalorder %s3230_s16, %s2971_s9  ;;  %s2976_s13 = sshll.u32 %s3102_s12, 4  ;;  %s2977_s13 = int_to_ptr.vmem [resolvable:$false] %s2976_s13 }
  0x26   : > { %s2978_s15 = scalar_lea.vmem %s2977_s13, 2048  ;;  %p2979_p9 = scmp.lt.s32.totalorder %s3230_s16, %s2977_s13 }
  0x27   : > { %p2974_p3 = pnand %p2972_p1, %p2958_p2  ;;  %p2980_p4 = scmp.lt.s32.totalorder %s2978_s15, %s2971_s9 }
  0x29   : > { %p2975_p11 = pneg %p2974_p3  ;;  %p2981_p6 = por %p2980_p4, %p2979_p9 }
  0x2b   : > { %p2982_p7 = pnand %p2981_p6, %p2975_p11 }
  0x2d   : > { %2985 = shalt.err (!%p2982_p7)
}
  0x2e   : > { %s3103_s25 = smov 256   ;;  %s3104_s27 = smov 128  }
  0x2f   : > { %s3105_s29 = smov 8   ;;  %p2610_p12 = scmp.ge.s32.totalorder %s3100_s23, 1 }
  0x30   : > { %2848 = dma.hbm_to_vmem [thread:$0]  (!%p3234_p0), %s3228_s14, 1024, %s3230_s16, %s3238_s24, %s3103_s25, %s3104_s27, %s3105_s29  }
  0x31   : > { %p234_p2 = scmp.lt.s32.totalorder %s3100_s23, 3 }
  0x33   : > { %p235_p5 = pnand %p2610_p12, %p234_p2 }
  0x34   : > { %s3269_s28 = sand.u32 (!%p235_p5), 1, %s3084_s19  }
  0x35   : > { %238 = sbr.rel (%p235_p5) target bundleno = 1307 (0x51b), region = 36  ;;  %s2611_s10 = sshll.u32 (!%p235_p5), %s3269_s28, 6 }
  0x36   : > { %s241_s11 = scalar_lea.sflag (!%p235_p5), [#allocation4], %s3269_s28  ;;  %s244_s9 = scalar_lea.vmem (!%p235_p5), [#allocation3], %s2611_s10 }
  0x3c   : > { %3067 = dma.done.wait (%p3206_p8), %s241_s11, 1024  }
  0x3d   : > { %3069 = vsyncadd (%p3206_p8), %s241_s11, 4294966272  ;;  %v3277_v0 = vld [vmem:[%s244_s9] sm:$0xff]  ;;  %v3279_v1 = vld [vmem:[%s244_s9 + $0x10] sm:$0xff]  ;;  %s3106_s14 = smov 112   ;;  %vm322_vm0 = vcmask 130048   ;;  %v655_v35 = vlaneseq  ;;  %vm456_vm1 = vcmask 261120  }
  0x3e   : > { %306 = vrot.lane.b32.xlu0 %v3277_v0, %s3106_s14  ;;  %310 = vrot.lane.b32.xlu1 %v3279_v1, %s3106_s14  ;;  %v963_v2 = vcombine.low %v3277_v0, %v3279_v1  ;;  %v964_v3 = vcombine.high %v3277_v0, %v3279_v1  ;;  %v3289_v4 = vld [vmem:[%s244_s9 + $0x8] sm:$0xff]  ;;  %v3291_v5 = vld [vmem:[%s244_s9 + $0x18] sm:$0xff]  ;;  %v3107_v33 = vmov 1983009808   ;;  %v3108_v50 = vmov 1934713408  }
  0x3f   : > { %v979_v6 = vcombine.low %v3289_v4, %v3291_v5  ;;  %v980_v7 = vcombine.high %v3289_v4, %v3291_v5  ;;  %v3297_v8 = vld [vmem:[%s244_s9 + $0x20] sm:$0xff]  ;;  %v3299_v9 = vld [vmem:[%s244_s9 + $0x28] sm:$0xff]  ;;  %v294_v10 = vld [vmem:[%s244_s9 + $0x30] sm:$0xff]  ;;  %v653_v34 = vunpack.c.l.s4 %v3107_v33  ;;  %v656_v37 = vshrl.u32 %v655_v35, 7  ;;  %s3111_s30 = smov 44   ;;  %s3112_s16 = smov 4  }
  0x40   : > { %v995_v11 = vcombine.low %v3297_v8, %v294_v10  ;;  %v996_v12 = vcombine.high %v3297_v8, %v294_v10  ;;  %v295_v13 = vld [vmem:[%s244_s9 + $0x38] sm:$0xff]  ;;  %v297_v15 = vld [vmem:[%s3728_s1 + $0x8] sm:$0xff]  ;;  %v454_v30 = vld [vmem:[%s3729_s2 + $0x10] sm:$0xff]  ;;  %v717_v51 = vunpack.c.l.s4 %v3108_v50  ;;  %vm951_vm2 = vcmask 64512   ;;  %s3109_s9 = smov 36   ;;  %s3113_s17 = smov 8  }
  0x41   : > { %v296_v14 = vld [vmem:[%s3728_s1] sm:$0xff]  ;;  %v1011_v16 = vcombine.low %v3299_v9, %v295_v13  ;;  %v1012_v17 = vcombine.high %v3299_v9, %v295_v13  ;;  %v453_v19 = vld [vmem:[%s3729_s2 + $0x8] sm:$0xff]  ;;  %v455_v31 = vld [vmem:[%s3729_s2 + $0x18] sm:$0xff]  ;;  %v654_v36 = vunpack.c.0.s8 %v653_v34  ;;  %vm586_vm3 = vcmask 31744   ;;  %s3114_s24 = smov 40   ;;  %s3115_s12 = smov 12  }
  0x42   : > { %v452_v18 = vld [vmem:[%s3729_s2] sm:$0xff]  ;;  %308 = vrot.lane.b32.xlu0 %v3289_v4, %s3106_s14  ;;  %312 = vrot.lane.b32.xlu1 %v3291_v5, %s3106_s14  ;;  %v2811_v20 = vpack.c.bf16 %v297_v15, %v296_v14  ;;  %v2819_v32 = vpack.c.bf16 %v455_v31, %v454_v30  ;;  %v718_v57 = vunpack.c.0.s8 %v717_v51  ;;  %s3734_s13 = smov 24   ;;  %s3118_s10 = smov 16   ;;  %vm3124_vm4 = vmmov 0  }
  0x43   : > { %v2815_v21 = vpack.c.bf16 %v453_v19, %v452_v18  ;;  %v3341_v38 = vsub.s32 %v654_v36, %v656_v37  ;;  %s3119_s11 = smov 48   ;;  %s3120_s15 = smov 20   ;;  %vm953_vm5 = vcmask 97280   ;;  %vm956_vm6 = vcmask 162816  }
  0x44   : > { %2812 = vmatprep.subr.bf16.mxu0 %v2811_v20  ;;  %v3354_v58 = vsub.s32 %v718_v57, %v656_v37  ;;  %s3121_s25 = smov 56   ;;  %s3126_s27 = smov 60   ;;  %vm958_vm7 = vcmask 195584   ;;  %vm960_vm8 = vcmask 228352   ;;  %vm2343_vm9 = vcmask 293888  }
  0x45   : > { %2814 = vmatpush3.bf16.msra.mxu0 %v2811_v20  ;;  %2835 = vmatprep.subr.bf16.mxu1 %v2815_v21  ;;  %v971_v39 = vrot.slane %v963_v2, %v3341_v38  ;;  %v987_v40 = vrot.slane %v979_v6, %v3341_v38  ;;  %v1003_v41 = vrot.slane %v995_v11, %v3341_v38  ;;  %vm2345_vm10 = vcmask 326656   ;;  %p3741_p9 = scmp.ne.s32.totalorder %s3737_s6, 0 }
  0x46   : > { %314 = vrot.lane.b32.xlu0 %v3297_v8, %s3106_s14  ;;  %316 = vrot.lane.b32.xlu1 %v3299_v9, %s3106_s14  ;;  %v1019_v42 = vrot.slane %v1011_v16, %v3341_v38  ;;  %v978_v43 = vrot.slane %v964_v3, %v3341_v38  ;;  %v994_v44 = vrot.slane %v980_v7, %v3341_v38  ;;  %vm2347_vm11 = vcmask 359424  }
  0x47   : > { %2816 = vmatprep.subr.bf16.mxu0 %v2815_v21  ;;  %2837 = vmatpush3.bf16.msra.mxu1 %v2815_v21  ;;  %v1010_v45 = vrot.slane %v996_v12, %v3341_v38  ;;  %v1026_v46 = vrot.slane %v1012_v17, %v3341_v38  ;;  %v1027_v47 = vcombine.low %v971_v39, %v987_v40  ;;  %vm2349_vm12 = vcmask 392192  }
  0x48   : > { %2836 = vmatprep.subr.bf16.mxu1 %v2819_v32  ;;  %v1059_v48 = vcombine.low %v1003_v41, %v1019_v42  ;;  %v1028_v49 = vcombine.high %v971_v39, %v987_v40  ;;  %v1060_v52 = vcombine.high %v1003_v41, %v1019_v42  ;;  %v1043_v53 = vcombine.low %v978_v43, %v994_v44 }
  0x49   : > { %v1075_v54 = vcombine.low %v1010_v45, %v1026_v46  ;;  %v1044_v55 = vcombine.high %v978_v43, %v994_v44  ;;  %v1076_v56 = vcombine.high %v1010_v45, %v1026_v46  ;;  %v1035_v59 = vrot.slane %v1027_v47, %v3354_v58 }
  0x4a   : > { %318 = vrot.lane.b32.xlu0 %v294_v10, %s3106_s14  ;;  %320 = vrot.lane.b32.xlu1 %v295_v13, %s3106_s14  ;;  %v1067_v60 = vrot.slane %v1059_v48, %v3354_v58  ;;  %v1042_v61 = vrot.slane %v1028_v49, %v3354_v58  ;;  %v1074_v62 = vrot.slane %v1060_v52, %v3354_v58  ;;  %s3110_s14 = smov 32   ;;  %vm2351_vm13 = vcmask 424960  }
  0x4b   : > { %2838 = vmatpush3.bf16.msra.mxu1 %v2819_v32  ;;  %v1051_v63 = vrot.slane %v1043_v53, %v3354_v58  ;;  %v1083_v0 = vrot.slane %v1075_v54, %v3354_v58  ;;  %v1058_v1 = vrot.slane %v1044_v55, %v3354_v58  ;;  %v1090_v2 = vrot.slane %v1076_v56, %v3354_v58 }
  0x4c   : > { %v1091_v3 = vcombine.low %v1035_v59, %v1067_v60  ;;  %v1093_v4 = vcombine.low %v1042_v61, %v1074_v62  ;;  %v1094_v5 = vcombine.high %v1042_v61, %v1074_v62  ;;  %v1092_v6 = vcombine.high %v1035_v59, %v1067_v60 }
  0x4d   : > { %v1095_v7 = vcombine.low %v1051_v63, %v1083_v0  ;;  %v1096_v8 = vcombine.high %v1051_v63, %v1083_v0  ;;  %v1097_v9 = vcombine.low %v1058_v1, %v1090_v2  ;;  %v1098_v10 = vcombine.high %v1058_v1, %v1090_v2 }
  0x4e   : > { %vm2353_vm14 = vcmask 457728   ;;  %vm2355_vm15 = vcmask 490496  }
  0x68   : > { %1099 = vxpose.xlu0.b32.start.end [1/1] (short) (narrow) %v1091_v3, 16 }
  0x6d   : > { %1325 = vxpose.xlu0.b32.start.end [1/1] (short) (narrow) %v1093_v4, 16 }
  0x72   : > { %1438 = vxpose.xlu0.b32.start.end [1/1] (short) (narrow) %v1094_v5, 16 }
  0x73   : > { %1212 = vxpose.xlu1.b32.start.end [1/1] (short) (narrow) %v1092_v6, 16 }
  0x77   : > { %1551 = vxpose.xlu0.b32.start.end [1/1] (short) (narrow) %v1095_v7, 16 }
  0x78   : > { %1664 = vxpose.xlu1.b32.start.end [1/1] (short) (narrow) %v1096_v8, 16 }
  0x7c   : > { %1777 = vxpose.xlu0.b32.start.end [1/1] (short) (narrow) %v1097_v9, 16 }
  0x7d   : > { %1890 = vxpose.xlu1.b32.start.end [1/1] (short) (narrow) %v1098_v10, 16 }
  0xb0   : > { %v307_v22 = vpop.permute.xlu0 %306  ;;  %v311_v23 = vpop.permute.xlu1 %310 }
  0xb1   : > { %2720 = vmatprep.mubr.msk.f32.mxu0 %vm322_vm0, %v307_v22 }
  0xb4   : > { %v309_v24 = vpop.permute.xlu0 %308  ;;  %v313_v25 = vpop.permute.xlu1 %312 }
  0xb5   : > { %2721 = vmatmul.mubr.msk.f32.vlgmr.msra.gmra.mrb[0].mxu0 %vm322_vm0, %v309_v24 }
  0xb6   : > { %2723 = vmatprep.mubr.msk.f32.mxu0 %vm322_vm0, %v311_v23  ;;  %2818 = vmatpush3.bf16.msra.mxu0 %v2815_v21 }
  0xb7   : > { %2820 = vmatprep.subr.bf16.mxu0 %v2819_v32 }
  0xb8   : > { %v315_v26 = vpop.permute.xlu0 %314  ;;  %v317_v27 = vpop.permute.xlu1 %316 }
  0xb9   : > { %2724 = vmatmul.mubr.msk.f32.gmra.mrb[2].mxu0 %vm322_vm0, %v313_v25 }
  0xba   : > { %2726 = vmatprep.mubr.msk.f32.mxu0 %vm322_vm0, %v315_v26  ;;  %2822 = vmatpush3.bf16.msra.mxu0 %v2819_v32 }
  0xbc   : > { %v319_v28 = vpop.permute.xlu0 %318  ;;  %v321_v29 = vpop.permute.xlu1 %320 }
  0xbd   : > { %2727 = vmatmul.mubr.msk.f32.gmra.mrb[4].mxu0 %vm322_vm0, %v317_v27 }
  0xbe   : > { %2729 = vmatprep.mubr.msk.f32.mxu0 %vm322_vm0, %v319_v28 }
  0xc1   : > { %2730 = vmatmul.mubr.msk.f32.gmra.mrb[6].mxu0 %vm322_vm0, %v321_v29 }
  0xe8   : > { %v1115_v27 = vpop.trf.xlu0 }
  0xec   : > { %v3372_v28 = vpop.trf.xlu0 }
  0xf0   : > { %v1341_v29 = vpop.trf.xlu0 }
 0x188   : > { %v2722_v11 = vpop.f32.mrb[0].mxu0 }
 0x189   : > { %v405_v12 = vpop.f32.mrb[1].mxu0  ;;  %v445_v14 = vmax.f32 %v2722_v11, 0.0 }
 0x18a   : > { %v444_v13 = vmax.f32 %v405_v12, 0.0 }
 0x18c   : > { %v2725_v15 = vpop.f32.mrb[2].mxu0  ;;  %2740 = vmatprep.mubr.msk.f32.mxu0 %vm456_vm1, %v444_v13 }
 0x18d   : > { %v415_v16 = vpop.f32.mrb[3].mxu0  ;;  %2741 = vmatmul.mubr.msk.f32.vlgmr.msra.gmra.mrb[8].mxu0 %vm456_vm1, %v445_v14  ;;  %v447_v18 = vmax.f32 %v2725_v15, 0.0 }
 0x18e   : > { %v446_v17 = vmax.f32 %v415_v16, 0.0  ;;  %2754 = vmatprep.mubr.msk.f32.mxu0 %vm951_vm2, %v1115_v27 }
 0x190   : > { %v2728_v19 = vpop.f32.mrb[4].mxu0  ;;  %2743 = vmatprep.mubr.msk.f32.mxu1 %vm456_vm1, %v446_v17 }
 0x191   : > { %v425_v20 = vpop.f32.mrb[5].mxu0  ;;  %2744 = vmatmul.mubr.msk.f32.vlgmr.msra.gmra.mrb[0].mxu1 %vm456_vm1, %v447_v18  ;;  %v449_v22 = vmax.f32 %v2728_v19, 0.0 }
 0x192   : > { %v448_v21 = vmax.f32 %v425_v20, 0.0 }
 0x194   : > { %v2731_v23 = vpop.f32.mrb[6].mxu0  ;;  %2746 = vmatprep.mubr.msk.f32.mxu1 %vm456_vm1, %v448_v21 }
 0x195   : > { %v435_v24 = vpop.f32.mrb[7].mxu0  ;;  %2747 = vmatmul.mubr.msk.f32.gmra.mrb[2].mxu1 %vm456_vm1, %v449_v22  ;;  %v451_v26 = vmax.f32 %v2731_v23, 0.0 }
 0x196   : > { %v450_v25 = vmax.f32 %v435_v24, 0.0 }
 0x198   : > { %2749 = vmatprep.mubr.msk.f32.mxu1 %vm456_vm1, %v450_v25 }
 0x199   : > { %2750 = vmatmul.mubr.msk.f32.gmra.mrb[4].mxu1 %vm456_vm1, %v451_v26 }
 0x19a   : > { %2764 = vmatprep.mubr.msk.f32.mxu1 %vm951_vm2, %v1341_v29  ;;  %v3391_v29 = vpop.trf.xlu0 }
 0x260   : > { %v2742_v30 = vpop.f32.mrb[8].mxu0 }
 0x261   : > { %v547_v31 = vpop.f32.mrb[9].mxu0  ;;  %v588_v35 = vsel %vm586_vm3, %v2742_v30, -inf }
 0x262   : > { %v587_v39 = vsel %vm586_vm3, %v547_v31, -inf }
 0x264   : > { %v2745_v32 = vpop.f32.mrb[0].mxu1 }
 0x265   : > { %v557_v33 = vpop.f32.mrb[1].mxu1  ;;  %v590_v44 = vsel %vm586_vm3, %v2745_v32, -inf }
 0x266   : > { %v589_v48 = vsel %vm586_vm3, %v557_v33, -inf }
 0x268   : > { %v2748_v34 = vpop.f32.mrb[2].mxu1 }
 0x269   : > { %v593_v36 = vsel %vm586_vm3, %v2748_v34, -inf  ;;  %v567_v37 = vpop.f32.mrb[3].mxu1 }
 0x26a   : > { %v594_v40 = vmax.f32 %v588_v35, %v593_v36  ;;  %v591_v41 = vsel %vm586_vm3, %v567_v37, -inf  ;;  %v3398_v35 = vpop.trf.xlu1 }
 0x26b   : > { %v592_v42 = vmax.f32 %v587_v39, %v591_v41 }
 0x26c   : > { %v2751_v43 = vpop.f32.mrb[4].mxu1 }
 0x26d   : > { %v599_v45 = vmax.f32 %v592_v42, %v594_v40  ;;  %v597_v46 = vsel %vm586_vm3, %v2751_v43, -inf  ;;  %v577_v47 = vpop.f32.mrb[5].mxu1 }
 0x26e   : > { %v598_v49 = vmax.f32 %v590_v44, %v597_v46  ;;  %v595_v50 = vsel %vm586_vm3, %v577_v47, -inf }
 0x26f   : > { %v596_v51 = vmax.f32 %v589_v48, %v595_v50 }
 0x271   : > { %v600_v52 = vmax.f32 %v596_v51, %v598_v49 }
 0x273   : > { %v601_v53 = vmax.f32 %v599_v45, %v600_v52 }
 0x275   : > { %v602_v54 = vsub.f32 %v547_v31, %v601_v53  ;;  %v603_v55 = vsub.f32 %v2742_v30, %v601_v53  ;;  %v604_v56 = vsub.f32 %v557_v33, %v601_v53  ;;  %v605_v57 = vsub.f32 %v2745_v32, %v601_v53  ;;  %v3394_v32 = vpop.trf.xlu0 }
 0x276   : > { %v606_v59 = vsub.f32 %v567_v37, %v601_v53  ;;  %v607_v60 = vsub.f32 %v2748_v34, %v601_v53  ;;  %v608_v61 = vsub.f32 %v577_v47, %v601_v53  ;;  %v609_v62 = vsub.f32 %v2751_v43, %v601_v53 }
 0x277   : > { %v610_v63 = vmul.f32 1.442695, %v602_v54  ;;  %v612_v0 = vmul.f32 1.442695, %v603_v55  ;;  %v614_v1 = vmul.f32 1.442695, %v604_v56 }
 0x278   : > { %v616_v2 = vmul.f32 1.442695, %v605_v57  ;;  %v618_v3 = vmul.f32 1.442695, %v606_v59  ;;  %v620_v4 = vmul.f32 1.442695, %v607_v60  ;;  %v3407_v60 = vpop.trf.xlu1 }
 0x279   : > { %2938 = vpow2.f32 %v610_v63  ;;  %v622_v5 = vmul.f32 1.442695, %v608_v61  ;;  %v624_v6 = vmul.f32 1.442695, %v609_v62  ;;  %v3396_v33 = vpop.trf.xlu0 }
 0x27a   : > { %2940 = vpow2.f32 %v612_v0 }
 0x27b   : > { %2942 = vpow2.f32 %v614_v1 }
 0x27c   : > { %2944 = vpow2.f32 %v616_v2 }
 0x27d   : > { %2946 = vpow2.f32 %v618_v3  ;;  %v3400_v47 = vpop.trf.xlu0 }
 0x27e   : > { %2948 = vpow2.f32 %v620_v4 }
 0x27f   : > { %2950 = vpow2.f32 %v622_v5 }
 0x280   : > { %2952 = vpow2.f32 %v624_v6 }
 0x283   : > { %v2939_v7 = vpop.eup %2938 }
 0x284   : > { %v2941_v8 = vpop.eup %2940  ;;  %v626_v9 = vsel %vm586_vm3, %v2939_v7, 0.0 }
 0x285   : > { %v2943_v10 = vpop.eup %2942  ;;  %v627_v11 = vsel %vm586_vm3, %v2941_v8, 0.0 }
 0x286   : > { %v2945_v12 = vpop.eup %2944  ;;  %v628_v13 = vadd.f32 %v627_v11, %v626_v9  ;;  %v629_v14 = vsel %vm586_vm3, %v2943_v10, 0.0 }
 0x287   : > { %v2947_v15 = vpop.eup %2946  ;;  %v631_v17 = vsel %vm586_vm3, %v2945_v12, 0.0 }
 0x288   : > { %v630_v16 = vadd.f32 %v629_v14, %v628_v13  ;;  %v2949_v18 = vpop.eup %2948  ;;  %v633_v20 = vsel %vm586_vm3, %v2947_v15, 0.0 }
 0x289   : > { %v2951_v21 = vpop.eup %2950  ;;  %v635_v23 = vsel %vm586_vm3, %v2949_v18, 0.0 }
 0x28a   : > { %v632_v19 = vadd.f32 %v631_v17, %v630_v16  ;;  %v2953_v24 = vpop.eup %2952  ;;  %v637_v26 = vsel %vm586_vm3, %v2951_v21, 0.0 }
 0x28b   : > { %v639_v30 = vsel %vm586_vm3, %v2953_v24, 0.0 }
 0x28c   : > { %v634_v22 = vadd.f32 %v633_v20, %v632_v19 }
 0x28e   : > { %v636_v25 = vadd.f32 %v635_v23, %v634_v22 }
 0x290   : > { %v638_v27 = vadd.f32 %v637_v26, %v636_v25 }
 0x292   : > { %v640_v31 = vadd.f32 %v639_v30, %v638_v27 }
 0x294   : > { %2954 = vrcp.f32 %v640_v31 }
 0x29e   : > { %v2955_v34 = vpop.eup %2954 }
 0x29f   : > { %v646_v36 = vmul.f32 %v2955_v34, %v2947_v15  ;;  %v648_v37 = vmul.f32 %v2955_v34, %v2951_v21  ;;  %v642_v39 = vmul.f32 %v2955_v34, %v2939_v7  ;;  %v643_v40 = vmul.f32 %v2955_v34, %v2941_v8  ;;  %v3420_v21 = vpop.trf.xlu1 }
 0x2a0   : > { %v644_v41 = vmul.f32 %v2955_v34, %v2943_v10  ;;  %v645_v42 = vmul.f32 %v2955_v34, %v2945_v12  ;;  %v647_v43 = vmul.f32 %v2955_v34, %v2949_v18  ;;  %v649_v44 = vmul.f32 %v2955_v34, %v2953_v24  ;;  %v1568_v12 = vpop.trf.xlu0 }
 0x2a1   : > { %v682_v45 = vcombine.low %v646_v36, %v648_v37  ;;  %v683_v46 = vcombine.high %v646_v36, %v648_v37 }
 0x2a2   : > { %v650_v48 = vcombine.low %v642_v39, %v644_v41  ;;  %v666_v49 = vcombine.low %v643_v40, %v645_v42  ;;  %v698_v50 = vcombine.low %v647_v43, %v649_v44  ;;  %v651_v51 = vcombine.high %v642_v39, %v644_v41 }
 0x2a3   : > { %v690_v52 = vrot.slane %v682_v45, %v3341_v38  ;;  %v667_v53 = vcombine.high %v643_v40, %v645_v42  ;;  %v697_v54 = vrot.slane %v683_v46, %v3341_v38  ;;  %v699_v55 = vcombine.high %v647_v43, %v649_v44 }
 0x2a4   : > { %v658_v56 = vrot.slane %v650_v48, %v3341_v38  ;;  %v674_v57 = vrot.slane %v666_v49, %v3341_v38  ;;  %v706_v59 = vrot.slane %v698_v50, %v3341_v38  ;;  %v665_v61 = vrot.slane %v651_v51, %v3341_v38  ;;  %v1793_v37 = vpop.trf.xlu0 }
 0x2a5   : > { %v681_v62 = vrot.slane %v667_v53, %v3341_v38  ;;  %v713_v63 = vrot.slane %v699_v55, %v3341_v38 }
 0x2a6   : > { %v714_v0 = vcombine.low %v658_v56, %v674_v57  ;;  %v746_v1 = vcombine.low %v690_v52, %v706_v59  ;;  %v715_v2 = vcombine.high %v658_v56, %v674_v57  ;;  %v747_v3 = vcombine.high %v690_v52, %v706_v59 }
 0x2a7   : > { %v730_v4 = vcombine.low %v665_v61, %v681_v62  ;;  %v762_v5 = vcombine.low %v697_v54, %v713_v63  ;;  %v731_v6 = vcombine.high %v665_v61, %v681_v62  ;;  %v763_v7 = vcombine.high %v697_v54, %v713_v63 }
 0x2a8   : > { %v722_v8 = vrot.slane %v714_v0, %v3354_v58  ;;  %v754_v9 = vrot.slane %v746_v1, %v3354_v58  ;;  %v729_v10 = vrot.slane %v715_v2, %v3354_v58  ;;  %v761_v11 = vrot.slane %v747_v3, %v3354_v58  ;;  %v1794_v55 = vpop.trf.xlu0 }
 0x2a9   : > { %v738_v13 = vrot.slane %v730_v4, %v3354_v58  ;;  %v770_v14 = vrot.slane %v762_v5, %v3354_v58  ;;  %v745_v15 = vrot.slane %v731_v6, %v3354_v58  ;;  %v777_v16 = vrot.slane %v763_v7, %v3354_v58 }
 0x2aa   : > { %v778_v17 = vcombine.low %v722_v8, %v754_v9  ;;  %v780_v18 = vcombine.low %v729_v10, %v761_v11  ;;  %v779_v19 = vcombine.high %v722_v8, %v754_v9  ;;  %v781_v20 = vcombine.high %v729_v10, %v761_v11 }
 0x2ab   : > { %v782_v22 = vcombine.low %v738_v13, %v770_v14  ;;  %v784_v23 = vcombine.low %v745_v15, %v777_v16  ;;  %v3422_v24 = vcombine.high %v738_v13, %v770_v14  ;;  %v3424_v25 = vcombine.high %v745_v15, %v777_v16 }
 0x2ac   : > { %2752 = vmatprep.subr.mxu0 %v778_v17  ;;  %2762 = vmatprep.subr.mxu1 %v780_v18  ;;  %v2630_v26 = vcombine.low %v722_v8, %v729_v10  ;;  %v2632_v27 = vcombine.high %v722_v8, %v729_v10  ;;  %v2634_v30 = vcombine.low %v738_v13, %v745_v15 }
 0x2ad   : > { %2753 = vmatpush3.msra.mxu0 %v778_v17  ;;  %2763 = vmatpush3.msra.mxu1 %v780_v18  ;;  %v2636_v31 = vcombine.high %v738_v13, %v745_v15  ;;  %v2631_v34 = vcombine.low %v754_v9, %v761_v11  ;;  %v2633_v36 = vcombine.high %v754_v9, %v761_v11 }
 0x2ae   : > { %2755 = vmatmul.mubr.msk.f32.vlgmr.msra.gmra.mrb[10].mxu0 %vm951_vm2, %v3372_v28  ;;  %2757 = vmatprep.subr.mxu0 %v779_v19  ;;  %v794_v39 = vrot.slane %v2630_v26, %v3341_v38  ;;  %v810_v40 = vrot.slane %v2632_v27, %v3341_v38  ;;  %v826_v41 = vrot.slane %v2634_v30, %v3341_v38  ;;  %v1681_v28 = vpop.trf.xlu1 }
 0x2af   : > { %2765 = vmatmul.mubr.msk.f32.vlgmr.msra.gmra.mrb[6].mxu1 %vm951_vm2, %v3391_v29  ;;  %2772 = vmatprep.subr.mxu1 %v782_v22  ;;  %v842_v42 = vrot.slane %v2636_v31, %v3341_v38  ;;  %v801_v43 = vrot.slane %v2631_v34, %v3341_v38  ;;  %v817_v44 = vrot.slane %v2633_v36, %v3341_v38 }
 0x2b0   : > { %2758 = vmatpush3.msra.mxu0 %v779_v19  ;;  %2759 = vmatprep.mubr.msk.f32.mxu0 %vm951_vm2, %v3398_v35  ;;  %v850_v45 = vcombine.low %v794_v39, %v810_v40  ;;  %v851_v46 = vcombine.high %v794_v39, %v810_v40  ;;  %v2635_v48 = vcombine.low %v770_v14, %v777_v16 }
 0x2b1   : > { %2773 = vmatpush3.msra.mxu1 %v782_v22  ;;  %2767 = vmatprep.subr.mxu0 %v781_v20  ;;  %v882_v49 = vcombine.low %v826_v41, %v842_v42  ;;  %v883_v50 = vcombine.high %v826_v41, %v842_v42  ;;  %v2637_v29 = vcombine.high %v770_v14, %v777_v16 }
 0x2b2   : > { %2782 = vmatprep.subr.mxu1 %v784_v23  ;;  %2774 = vmatprep.mubr.msk.f32.mxu1 %vm951_vm2, %v3400_v47  ;;  %v3441_v51 = vrot.slane %v850_v45, %v3354_v58  ;;  %v3444_v52 = vrot.slane %v851_v46, %v3354_v58  ;;  %v833_v35 = vrot.slane %v2635_v48, %v3341_v38  ;;  %v1906_v62 = vpop.trf.xlu1 }
 0x2b3   : > { %2760 = vmatmul.mubr.msk.f32.vlgmr.msra.gmra.mrb[12].mxu0 %vm951_vm2, %v3407_v60  ;;  %2775 = vmatmul.mubr.msk.f32.vlgmr.msra.gmra.mrb[8].mxu1 %vm951_vm2, %v1568_v12  ;;  %v3451_v53 = vrot.slane %v882_v49, %v3354_v58  ;;  %v3454_v54 = vrot.slane %v883_v50, %v3354_v58  ;;  %v849_v47 = vrot.slane %v2637_v29, %v3341_v38 }
 0x2b4   : > { %2768 = vmatpush3.msra.mxu0 %v781_v20  ;;  %2783 = vmatpush3.msra.mxu1 %v784_v23  ;;  %v866_v56 = vcombine.low %v801_v43, %v817_v44  ;;  %v867_v57 = vcombine.high %v801_v43, %v817_v44 }
 0x2b5   : > { %2769 = vmatprep.mubr.msk.f32.mxu0 %vm951_vm2, %v3394_v32  ;;  %2777 = vmatprep.subr.mxu0 %v3422_v24  ;;  %v915_v59 = vcombine.high %v3441_v51, %v3451_v53  ;;  %v917_v60 = vcombine.high %v3444_v52, %v3454_v54  ;;  %v898_v61 = vcombine.low %v833_v35, %v849_v47 }
 0x2b6   : > { %2784 = vmatprep.mubr.msk.f32.mxu1 %vm951_vm2, %v1793_v37  ;;  %v3466_v63 = vrot.slane %v866_v56, %v3354_v58  ;;  %v916_v0 = vcombine.low %v3444_v52, %v3454_v54  ;;  %v3471_v32 = vrot.slane %v867_v57, %v3354_v58  ;;  %v899_v1 = vcombine.high %v833_v35, %v849_v47  ;;  %v1907_v8 = vpop.trf.xlu1 }
 0x2b7   : > { %2770 = vmatmul.mubr.msk.f32.vlgmr.msra.gmra.mrb[14].mxu0 %vm951_vm2, %v3396_v33  ;;  %2785 = vmatmul.mubr.msk.f32.vlgmr.msra.gmra.mrb[10].mxu1 %vm951_vm2, %v1794_v55  ;;  %v3477_v2 = vrot.slane %v898_v61, %v3354_v58  ;;  %v914_v3 = vcombine.low %v3441_v51, %v3451_v53 }
 0x2b8   : > { %2778 = vmatpush3.msra.mxu0 %v3422_v24  ;;  %2779 = vmatprep.mubr.msk.f32.mxu0 %vm951_vm2, %v3420_v21  ;;  %v3485_v4 = vrot.slane %v899_v1, %v3354_v58 }
 0x2b9   : > { %2787 = vmatprep.subr.mxu0 %v3424_v25  ;;  %v919_v33 = vcombine.high %v3466_v63, %v3477_v2  ;;  %v918_v5 = vcombine.low %v3466_v63, %v3477_v2 }
 0x2ba   : > { %v921_v6 = vcombine.high %v3471_v32, %v3485_v4  ;;  %v920_v7 = vcombine.low %v3471_v32, %v3485_v4 }
 0x2bb   : > { %2780 = vmatmul.mubr.msk.f32.vlgmr.msra.gmra.mrb[16].mxu0 %vm951_vm2, %v1681_v28 }
 0x2bc   : > { %2788 = vmatpush3.msra.mxu0 %v3424_v25  ;;  %2789 = vmatprep.mubr.msk.f32.mxu0 %vm951_vm2, %v1906_v62 }
 0x2bf   : > { %2790 = vmatmul.mubr.msk.f32.vlgmr.msra.gmra.mrb[18].mxu0 %vm951_vm2, %v1907_v8 }
 0x381   : > { %v2756_v9 = vpop.f32.mrb[10].mxu0 }
 0x382   : > { %v2766_v10 = vpop.f32.mrb[6].mxu1  ;;  %v1203_v11 = vpop.f32.mrb[11].mxu0 }
 0x383   : > { %v2139_v12 = vcombine.low %v2756_v9, %v2766_v10  ;;  %v2140_v13 = vcombine.high %v2756_v9, %v2766_v10  ;;  %v1429_v14 = vpop.f32.mrb[7].mxu1 }
 0x384   : > { %v2003_v15 = vcombine.low %v1203_v11, %v1429_v14  ;;  %v2004_v16 = vcombine.high %v1203_v11, %v1429_v14 }
 0x385   : > { %v2147_v39 = vrot.slane %v2139_v12, %v3341_v38  ;;  %v2154_v40 = vrot.slane %v2140_v13, %v3341_v38 }
 0x386   : > { %v2761_v17 = vpop.f32.mrb[12].mxu0  ;;  %v2776_v18 = vpop.f32.mrb[8].mxu1  ;;  %v2011_v43 = vrot.slane %v2003_v15, %v3341_v38  ;;  %v2018_v44 = vrot.slane %v2004_v16, %v3341_v38 }
 0x387   : > { %v1316_v19 = vpop.f32.mrb[13].mxu0  ;;  %v1655_v20 = vpop.f32.mrb[9].mxu1 }
 0x38a   : > { %v2771_v21 = vpop.f32.mrb[14].mxu0  ;;  %v2786_v22 = vpop.f32.mrb[10].mxu1 }
 0x38b   : > { %v2155_v23 = vcombine.low %v2761_v17, %v2771_v21  ;;  %v2156_v24 = vcombine.high %v2761_v17, %v2771_v21  ;;  %v1542_v25 = vpop.f32.mrb[15].mxu0  ;;  %v2171_v26 = vcombine.low %v2776_v18, %v2786_v22  ;;  %v2172_v27 = vcombine.high %v2776_v18, %v2786_v22  ;;  %v1881_v30 = vpop.f32.mrb[11].mxu1 }
 0x38c   : > { %v2019_v31 = vcombine.low %v1316_v19, %v1542_v25  ;;  %v2020_v34 = vcombine.high %v1316_v19, %v1542_v25  ;;  %v2035_v36 = vcombine.low %v1655_v20, %v1881_v30  ;;  %v2036_v37 = vcombine.high %v1655_v20, %v1881_v30 }
 0x38d   : > { %v2163_v41 = vrot.slane %v2155_v23, %v3341_v38  ;;  %v2170_v42 = vrot.slane %v2156_v24, %v3341_v38  ;;  %v2179_v61 = vrot.slane %v2171_v26, %v3341_v38  ;;  %v2186_v62 = vrot.slane %v2172_v27, %v3341_v38 }
 0x38e   : > { %v2027_v28 = vrot.slane %v2019_v31, %v3341_v38  ;;  %v2034_v45 = vrot.slane %v2020_v34, %v3341_v38  ;;  %v2781_v46 = vpop.f32.mrb[16].mxu0  ;;  %v2043_v1 = vrot.slane %v2035_v36, %v3341_v38  ;;  %v2050_v8 = vrot.slane %v2036_v37, %v3341_v38 }
 0x38f   : > { %v2203_v48 = vcombine.low %v2147_v39, %v2163_v41  ;;  %v2204_v49 = vcombine.high %v2147_v39, %v2163_v41  ;;  %v2219_v50 = vcombine.low %v2154_v40, %v2170_v42  ;;  %v2220_v29 = vcombine.high %v2154_v40, %v2170_v42  ;;  %v1768_v35 = vpop.f32.mrb[17].mxu0 }
 0x390   : > { %v2067_v47 = vcombine.low %v2011_v43, %v2027_v28  ;;  %v2068_v55 = vcombine.high %v2011_v43, %v2027_v28  ;;  %v2083_v56 = vcombine.low %v2018_v44, %v2034_v45  ;;  %v2084_v57 = vcombine.high %v2018_v44, %v2034_v45 }
 0x391   : > { %v2211_v13 = vrot.slane %v2203_v48, %v3354_v58  ;;  %v2218_v14 = vrot.slane %v2204_v49, %v3354_v58  ;;  %v3515_v17 = vrot.slane %v2219_v50, %v3354_v58  ;;  %v3518_v18 = vrot.slane %v2220_v29, %v3354_v58 }
 0x392   : > { %v2791_v9 = vpop.f32.mrb[18].mxu0  ;;  %v3523_v21 = vrot.slane %v2067_v47, %v3354_v58  ;;  %v2082_v22 = vrot.slane %v2068_v55, %v3354_v58  ;;  %v3529_v25 = vrot.slane %v2084_v57, %v3354_v58  ;;  %v3532_v26 = vrot.slane %v2083_v56, %v3354_v58 }
 0x393   : > { %v2187_v10 = vcombine.low %v2781_v46, %v2791_v9  ;;  %v2188_v11 = vcombine.high %v2781_v46, %v2791_v9  ;;  %v1994_v12 = vpop.f32.mrb[19].mxu0 }
 0x394   : > { %v2051_v15 = vcombine.low %v1768_v35, %v1994_v12  ;;  %v2052_v16 = vcombine.high %v1768_v35, %v1994_v12  ;;  %v2361_v12 = vld [vmem:[%s3730_s3 + $0x8] sm:$0xff] }
 0x395   : > { %v2195_v19 = vrot.slane %v2187_v10, %v3341_v38  ;;  %v2202_v20 = vrot.slane %v2188_v11, %v3341_v38  ;;  %v2360_v11 = vld [vmem:[%s3730_s3] sm:$0xff] }
 0x396   : > { %v2059_v23 = vrot.slane %v2051_v15, %v3341_v38  ;;  %v2066_v24 = vrot.slane %v2052_v16, %v3341_v38  ;;  %v2362_v15 = vld [vmem:[%s3730_s3 + $0x10] sm:$0xff]  ;;  %v2363_v16 = vld [vmem:[%s3730_s3 + $0x18] sm:$0xff] }
 0x397   : > { %v2235_v27 = vcombine.low %v2179_v61, %v2195_v19  ;;  %v2236_v30 = vcombine.high %v2179_v61, %v2195_v19  ;;  %v2251_v31 = vcombine.low %v2186_v62, %v2202_v20  ;;  %v2252_v34 = vcombine.high %v2186_v62, %v2202_v20  ;;  %v2365_v19 = vld [vmem:[%s3730_s3 + $0x28] sm:$0xff] }
 0x398   : > { %v2099_v36 = vcombine.low %v2043_v1, %v2059_v23  ;;  %v2100_v37 = vcombine.high %v2043_v1, %v2059_v23  ;;  %v2115_v39 = vcombine.low %v2050_v8, %v2066_v24  ;;  %v2116_v40 = vcombine.high %v2050_v8, %v2066_v24  ;;  %v2367_v23 = vld [vmem:[%s3730_s3 + $0x38] sm:$0xff] }
 0x399   : > { %v2243_v41 = vrot.slane %v2235_v27, %v3354_v58  ;;  %v2250_v42 = vrot.slane %v2236_v30, %v3354_v58  ;;  %v3537_v38 = vrot.slane %v2251_v31, %v3354_v58  ;;  %v3540_v43 = vrot.slane %v2252_v34, %v3354_v58 }
 0x39a   : > { %v3543_v44 = vrot.slane %v2099_v36, %v3354_v58  ;;  %v2114_v28 = vrot.slane %v2100_v37, %v3354_v58  ;;  %v2130_v45 = vrot.slane %v2116_v40, %v3354_v58  ;;  %v2123_v46 = vrot.slane %v2115_v39, %v3354_v58 }
 0x39b   : > { %v2268_v48 = vcombine.high %v2211_v13, %v2243_v41  ;;  %v2267_v49 = vcombine.low %v2211_v13, %v2243_v41  ;;  %v2270_v50 = vcombine.high %v2218_v14, %v2250_v42  ;;  %v2269_v29 = vcombine.low %v2218_v14, %v2250_v42 }
 0x39c   : > { %v2132_v35 = vcombine.high %v3523_v21, %v3543_v44  ;;  %v2133_v47 = vcombine.low %v2082_v22, %v2114_v28  ;;  %v2134_v55 = vcombine.high %v2082_v22, %v2114_v28  ;;  %v2137_v56 = vcombine.low %v3529_v25, %v2130_v45  ;;  %v2366_v22 = vld [vmem:[%s3730_s3 + $0x30] sm:$0xff] }
 0x39d   : > { %2308 = vrot.lane.b32.xlu1 %v2268_v48, %s3109_s9  ;;  %2304 = vrot.lane.b32.xlu0 %v2267_v49, %s3110_s14  ;;  %v2135_v57 = vcombine.low %v3532_v26, %v2123_v46  ;;  %v2271_v58 = vcombine.low %v3515_v17, %v3537_v38  ;;  %v2136_v61 = vcombine.high %v3532_v26, %v2123_v46  ;;  %v3117_v13 = vmov 0.0|0.0   ;;  %s2450_s14 = scalar_lea.sflag [#allocation8], %s3269_s28 }
 0x39e   : > { %v2273_v62 = vcombine.low %v3518_v18, %v3540_v43  ;;  %v2138_v1 = vcombine.high %v3529_v25, %v2130_v45  ;;  %v2272_v8 = vcombine.high %v3515_v17, %v3537_v38  ;;  %v2274_v9 = vcombine.high %v3518_v18, %v3540_v43  ;;  %2823 = vmatprep.subr.bf16.mxu1 %v3117_v13  ;;  %v2364_v18 = vld [vmem:[%s3730_s3 + $0x20] sm:$0xff] }
 0x39f   : > { %v2131_v10 = vcombine.low %v3523_v21, %v3543_v44  ;;  %v2824_v14 = vpack.c.bf16 %v2361_v12, %v2360_v11  ;;  %v2827_v17 = vpack.c.bf16 %v2363_v16, %v2362_v15  ;;  %v2830_v20 = vpack.c.bf16 %v2365_v19, %v2364_v18 }
 0x3a0   : > { %v2833_v24 = vpack.c.bf16 %v2367_v23, %v2366_v22  ;;  %v3125_v25 = vmov 0.0  }
 0x3a1   : > { %2316 = vrot.lane.b32.xlu1 %v2270_v50, %s3111_s30  ;;  %2276 = vrot.lane.b32.xlu0 %v2132_v35, %s3112_s16 }
 0x3a2   : > { %2825 = vmatpush3.bf16.msra.mxu1 %v2824_v14  ;;  %2808 = vmatprep.mubr.msk.f32.mxu1 %vm3124_vm4, %v3125_v25  ;;  %vm2357_vm4 = vcmask 523264  }
 0x3a3   : > { %2826 = vmatprep.subr.bf16.mxu1 %v3117_v13 }
 0x3a5   : > { %2280 = vrot.lane.b32.xlu1 %v2133_v47, %s3113_s17  ;;  %2312 = vrot.lane.b32.xlu0 %v2269_v29, %s3114_s24  ;;  %s3127_s24 = smov [#allocation7]  }
 0x3a6   : > { %2828 = vmatpush3.bf16.msra.mxu1 %v2827_v17 }
 0x3a7   : > { %2829 = vmatprep.subr.bf16.mxu1 %v3117_v13 }
 0x3a9   : > { %2284 = vrot.lane.b32.xlu1 %v2134_v55, %s3115_s12  ;;  %2296 = vrot.lane.b32.xlu0 %v2137_v56, %s3734_s13  ;;  %s3123_s13 = smov 52  }
 0x3aa   : > { %2831 = vmatpush3.bf16.msra.mxu1 %v2830_v20 }
 0x3ab   : > { %2832 = vmatprep.subr.bf16.mxu1 %v3117_v13 }
 0x3ad   : > { %2288 = vrot.lane.b32.xlu1 %v2135_v57, %s3118_s10  ;;  %2320 = vrot.lane.b32.xlu0 %v2271_v58, %s3119_s11 }
 0x3ae   : > { %2834 = vmatpush3.bf16.msra.mxu1 %v2833_v24 }
 0x3b1   : > { %2292 = vrot.lane.b32.xlu1 %v2136_v61, %s3120_s15  ;;  %2328 = vrot.lane.b32.xlu0 %v2273_v62, %s3121_s25  ;;  %s3122_s25 = smov 28  }
 0x3b5   : > { %2300 = vrot.lane.b32.xlu1 %v2138_v1, %s3122_s25  ;;  %923 = vrot.lane.b32.xlu0 %v915_v59, %s3112_s16  ;;  %s3740_s16 = smov 24  }
 0x3b9   : > { %2324 = vrot.lane.b32.xlu1 %v2272_v8, %s3123_s13  ;;  %931 = vrot.lane.b32.xlu0 %v917_v60, %s3115_s12 }
 0x3bd   : > { %2332 = vrot.lane.b32.xlu1 %v2274_v9, %s3126_s27  ;;  %939 = vrot.lane.b32.xlu0 %v919_v33, %s3120_s15 }
 0x3c1   : > { %927 = vrot.lane.b32.xlu1 %v916_v0, %s3113_s17  ;;  %947 = vrot.lane.b32.xlu0 %v921_v6, %s3122_s25  ;;  %s2612_s17 = sshll.u32 %s3269_s28, 3  ;;  %s2990_s25 = sshll.u32 %s3127_s24, 4  ;;  %s2991_s25 = int_to_ptr.vmem [resolvable:$false] %s2990_s25 }
 0x3c2   : > { %s279_s12 = scalar_lea.vmem [#allocation7], %s2612_s17  ;;  %s2992_s13 = scalar_lea.vmem %s2991_s25, 256 }
 0x3c3   : > { %s2477_s9 = sshll.u32 %s279_s12, 4  ;;  %s2478_s9 = int_to_ptr.vmem [resolvable:$true] %s2477_s9 }
 0x3c4   : > { %s2986_s30 = scalar_lea.vmem %s2478_s9, 128  ;;  %p2993_p10 = scmp.lt.s32.totalorder %s2478_s9, %s2991_s25 }
 0x3c5   : > { %935 = vrot.lane.b32.xlu1 %v918_v5, %s3118_s10  ;;  %s2657_s10 = sshll.u32 %s3092_s21, 7  ;;  %p2987_p8 = scmp.ne.s32.totalorder %s2478_s9, %s2986_s30 }
 0x3c6   : > { %s3650_s11 = scalar_lea.hbm %s3732_s5, %s2657_s10  ;;  %p2994_p13 = scmp.lt.s32.totalorder %s2992_s13, %s2986_s30 }
 0x3c7   : > { %p2988_p11 = pnand %p2987_p8, %p3741_p9 }
 0x3c8   : > { %p2995_p1 = por %p2994_p13, %p2993_p10 }
 0x3c9   : > { %943 = vrot.lane.b32.xlu1 %v920_v7, %s3740_s16  ;;  %p2989_p0 = pneg %p2988_p11 }
 0x3cb   : > { %p2996_p3 = pnand %p2995_p1, %p2989_p0 }
 0x40f   : > { %v2309_v59 = vpop.permute.xlu1 %2308  ;;  %v2305_v60 = vpop.permute.xlu0 %2304 }
 0x413   : > { %v2317_v33 = vpop.permute.xlu1 %2316  ;;  %v2277_v26 = vpop.permute.xlu0 %2276 }
 0x414   : > { %v2335_v63 = vsel %vm586_vm3, %v2131_v10, %v2277_v26 }
 0x417   : > { %v2281_v52 = vpop.permute.xlu1 %2280  ;;  %v2313_v54 = vpop.permute.xlu0 %2312 }
 0x418   : > { %v2336_v2 = vsel %vm951_vm2, %v2335_v63, %v2281_v52 }
 0x41b   : > { %v2285_v0 = vpop.permute.xlu1 %2284  ;;  %v2297_v27 = vpop.permute.xlu0 %2296 }
 0x41c   : > { %v2337_v32 = vsel %vm953_vm5, %v2336_v2, %v2285_v0 }
 0x41f   : > { %v2289_v6 = vpop.permute.xlu1 %2288  ;;  %v2321_v30 = vpop.permute.xlu0 %2320 }
 0x420   : > { %v2338_v4 = vsel %vm322_vm0, %v2337_v32, %v2289_v6 }
 0x423   : > { %v2293_v5 = vpop.permute.xlu1 %2292  ;;  %v2329_v31 = vpop.permute.xlu0 %2328 }
 0x424   : > { %v2339_v7 = vsel %vm956_vm6, %v2338_v4, %v2293_v5 }
 0x425   : > { %v2340_v36 = vsel %vm958_vm7, %v2339_v7, %v2297_v27 }
 0x427   : > { %v2301_v34 = vpop.permute.xlu1 %2300  ;;  %v924_v40 = vpop.permute.xlu0 %923 }
 0x428   : > { %v2341_v21 = vsel %vm960_vm8, %v2340_v36, %v2301_v34  ;;  %v950_v49 = vsel %vm586_vm3, %v914_v3, %v924_v40 }
 0x429   : > { %v2342_v37 = vsel %vm456_vm1, %v2341_v21, %v2305_v60 }
 0x42a   : > { %v2344_v39 = vsel %vm2343_vm9, %v2342_v37, %v2309_v59 }
 0x42b   : > { %v2325_v41 = vpop.permute.xlu1 %2324  ;;  %v2346_v42 = vsel %vm2345_vm10, %v2344_v39, %v2313_v54  ;;  %v932_v46 = vpop.permute.xlu0 %931 }
 0x42c   : > { %v2348_v38 = vsel %vm2347_vm11, %v2346_v42, %v2317_v33 }
 0x42d   : > { %v2350_v43 = vsel %vm2349_vm12, %v2348_v38, %v2321_v30 }
 0x42e   : > { %v2352_v44 = vsel %vm2351_vm13, %v2350_v43, %v2325_v41 }
 0x42f   : > { %v2333_v28 = vpop.permute.xlu1 %2332  ;;  %v2354_v45 = vsel %vm2353_vm14, %v2352_v44, %v2329_v31  ;;  %v940_v35 = vpop.permute.xlu0 %939 }
 0x430   : > { %v2356_v48 = vsel %vm2355_vm15, %v2354_v45, %v2333_v28 }
 0x431   : > { %2358 = vst.msk [vmem:[#allocation2] sm:$0xff] %vm2357_vm4, %v2356_v48 }
 0x433   : > { %v928_v50 = vpop.permute.xlu1 %927  ;;  %v948_v3 = vpop.permute.xlu0 %947 }
 0x434   : > { %v952_v29 = vsel %vm951_vm2, %v950_v49, %v928_v50 }
 0x435   : > { %v954_v55 = vsel %vm953_vm5, %v952_v29, %v932_v46 }
 0x437   : > { %v936_v47 = vpop.permute.xlu1 %935 }
 0x438   : > { %v955_v56 = vsel %vm322_vm0, %v954_v55, %v936_v47  ;;  %v2359_v57 = vld [vmem:[#allocation2] sm:$0xff] }
 0x439   : > { %2809 = vmatmul.mubr.msk.f32.vlgmr.msra.gmra.mrb[12].mxu1 %vm2357_vm4, %v2359_v57  ;;  %v957_v53 = vsel %vm956_vm6, %v955_v56, %v940_v35 }
 0x43b   : > { %v944_v51 = vpop.permute.xlu1 %943 }
 0x43c   : > { %v959_v58 = vsel %vm958_vm7, %v957_v53, %v944_v51 }
 0x43d   : > { %v961_v61 = vsel %vm960_vm8, %v959_v58, %v948_v3 }
 0x43e   : > { %962 = vst.msk [vmem:[%s279_s12] sm:$0xff] %vm456_vm1, %v961_v61 }
 0x43f   : > { %2999 = shalt.err (!%p2996_p3)
}
 0x440   : > { %s3000_s27 = scalar_lea.hbm %s3650_s11, 128  ;;  %s3004_s15 = scalar_lea.hbm %s3732_s5, 256 }
 0x441   : > { %p3001_p4 = scmp.ne.s32.totalorder %s3650_s11, %s3000_s27  ;;  %p3005_p12 = scmp.lt.u32.totalorder %s3650_s11, %s3732_s5 }
 0x442   : > { %p3006_p2 = scmp.lt.u32.totalorder %s3004_s15, %s3000_s27  ;;  %p3008_p8 = scmp.lt.u32.totalorder %s3000_s27, %s3650_s11 }
 0x443   : > { %p3002_p6 = pnand %p3001_p4, %p3741_p9 }
 0x444   : > { %p3007_p5 = por %p3006_p2, %p3005_p12 }
 0x445   : > { %p3003_p7 = pneg %p3002_p6 }
 0x446   : > { %p3009_p11 = por %p3008_p8, %p3007_p5 }
 0x448   : > { %p3010_p0 = pnand %p3009_p11, %p3003_p7 }
 0x44a   : > { %3013 = shalt.err (!%p3010_p0)
}
 0x44b   : > { %2842 = dma.vmem_to_hbm [thread:$0]  (%p3741_p9), %s2478_s9, 128, %s3650_s11, %s2450_s14  }
 0x44c   : > { %s272_s30 = scalar_lea.vmem [#allocation6], %s2612_s17  ;;  %s3677_s12 = scalar_lea.hbm %s3731_s4, %s2657_s10 }
 0x44d   : > { %s2464_s25 = sshll.u32 %s272_s30, 4  ;;  %s2445_s27 = scalar_lea.sflag [#allocation5], %s3269_s28  ;;  %s3679_s25 = int_to_ptr.vmem [resolvable:$true] %s2464_s25 }
 0x44e   : > { %s3014_s11 = scalar_lea.vmem %s3679_s25, 128  ;;  %s3128_s21 = smov [#allocation6]  }
 0x44f   : > { %p3015_p10 = scmp.ne.s32.totalorder %s3679_s25, %s3014_s11  ;;  %s3018_s17 = sshll.u32 %s3128_s21, 4  ;;  %s3019_s17 = int_to_ptr.vmem [resolvable:$false] %s3018_s17 }
 0x450   : > { %s3020_s10 = scalar_lea.vmem %s3019_s17, 256  ;;  %p3021_p3 = scmp.lt.s32.totalorder %s3679_s25, %s3019_s17 }
 0x451   : > { %p3016_p13 = pnand %p3015_p10, %p3741_p9  ;;  %p3022_p4 = scmp.lt.s32.totalorder %s3020_s10, %s3014_s11 }
 0x453   : > { %p3017_p1 = pneg %p3016_p13  ;;  %p3023_p6 = por %p3022_p4, %p3021_p3 }
 0x455   : > { %p3024_p7 = pnand %p3023_p6, %p3017_p1 }
 0x50c   : > { %v2438_v62 = vpop.f32.mrb[12].mxu1 }
 0x50d   : > { %2443 = vst.msk [vmem:[%s272_s30] sm:$0xff] %vm322_vm0, %v2438_v62  ;;  %v2810_v1 = vpop.f32.mrb[13].mxu1 }
 0x50e   : > { %3027 = shalt.err (!%p3024_p7)
}
 0x50f   : > { %s3028_s28 = scalar_lea.hbm %s3677_s12, 128  ;;  %s3032_s15 = scalar_lea.hbm %s3731_s4, 256 }
 0x510   : > { %p3029_p12 = scmp.ne.s32.totalorder %s3677_s12, %s3028_s28  ;;  %p3033_p8 = scmp.lt.u32.totalorder %s3677_s12, %s3731_s4 }
 0x511   : > { %p3034_p11 = scmp.lt.u32.totalorder %s3032_s15, %s3028_s28  ;;  %p3036_p10 = scmp.lt.u32.totalorder %s3028_s28, %s3677_s12 }
 0x512   : > { %p3030_p2 = pnand %p3029_p12, %p3741_p9 }
 0x513   : > { %p3035_p0 = por %p3034_p11, %p3033_p8 }
 0x514   : > { %p3031_p5 = pneg %p3030_p2 }
 0x515   : > { %p3037_p13 = por %p3036_p10, %p3035_p0 }
 0x517   : > { %p3038_p1 = pnand %p3037_p13, %p3031_p5 }
 0x519   : > { %3041 = shalt.err (!%p3038_p1)
}
 0x51a   : > { %2841 = dma.vmem_to_hbm [thread:$0]  (%p3741_p9), %s3679_s25, 128, %s3677_s12, %s2445_s27  }
 0x51b PF: > { %s2489_s30 = sand.u32 1, %s3080_s18   ;;  %p3742_p3 = scmp.ne.s32.totalorder %s3738_s8, 0 }
 0x51c   : > { %p3743_p4 = scmp.ge.s32.totalorder %s3100_s23, 2  ;;  %s2490_s13 = scalar_lea.sflag [#allocation5], %s2489_s30 }
 0x51e   : > { %p2850_p6 = pnand %p3743_p4, %p3742_p3 }
 0x520   : > { %3071 = dma.done.wait (!%p2850_p6), %s2490_s13, 128  }
 0x521   : > { %3073 = vsyncadd (!%p2850_p6), %s2490_s13, 4294967168  ;;  %s2499_s16 = scalar_lea.sflag [#allocation8], %s2489_s30 }
 0x522   : > { %3075 = dma.done.wait (!%p2850_p6), %s2499_s16, 128  }
 0x523   : > { %3077 = vsyncadd (!%p2850_p6), %s2499_s16, 4294967168  ;;  %s25_s23 = sadd.s32 1, %s3100_s23   ;;  %s3744_s18 = smov %s3084_s19 }
 0x524   : > { %p22_p7 = scmp.ge.s32.totalorder %s25_s23, 4   ;;  %s3745_s19 = smov %s3088_s20 }
 0x525   : > { %s3746_s20 = smov %s3215_s7  ;;  %s3747_s21 = smov %s3096_s22 }
 0x526   : > { %s3748_s22 = smov %s3750_s26  ;;  %24 = sbr.rel (!%p22_p7) target bundleno = 8 (0x8), region = 105 }
 0x52d   :  { %2504 = vsyncpa [#allocation4], 1 }
 0x52e   :  { %2506 = vsyncpa [#allocation4 + $0x1], 1 }
 0x52f   :  { %2507 = vsyncpa [#allocation5], 1 }
 0x530   :  { %2509 = vsyncpa [#allocation5 + $0x1], 1 }
 0x531   :  { %2510 = vsyncpa [#allocation8], 1 }
 0x532   :  { %2512 = vsyncpa [#allocation8 + $0x1], 1 }

// kernel: tpu_custom_call.1
= control target key start
LH: loop header
LB: loop body
LE: loop exit
PB: predicated region body
PF: predicated region fallthrough
CT: control target
= control target key end

     0   :  { %11 = vsyncpa [#allocation4], 0  ;;  %s3727_s0 = inlined_call_operand.hbm [shape: f32[8,16,32], index: 0, kind: input, shape index: {}]   ;;  %s3728_s1 = inlined_call_operand.vmem [shape: f32[16,32], index: 1, kind: input, shape index: {}]   ;;  %s3729_s2 = inlined_call_operand.vmem [shape: f32[32,4], index: 2, kind: input, shape index: {}]   ;;  %s3730_s3 = inlined_call_operand.vmem [shape: f32[64,16], index: 3, kind: input, shape index: {}]   ;;  %s3731_s4 = inlined_call_operand.hbm [shape: f32[16,16], index: 4, kind: output, shape index: {0}]   ;;  %s3732_s5 = inlined_call_operand.hbm [shape: f32[16,32], index: 5, kind: output, shape index: {1}]  }
   0x1   :  { %13 = vsyncpa [#allocation4 + $0x1], 0 }
   0x2   :  { %14 = vsyncpa [#allocation5], 0 }
   0x3   :  { %16 = vsyncpa [#allocation5 + $0x1], 0 }
   0x4   :  { %17 = vsyncpa [#allocation8], 0 }
   0x5   :  { %19 = vsyncpa [#allocation8 + $0x1], 0  ;;  %s3159_s18 = smov 0   ;;  %s3161_s19 = smov 0  }
   0x6   :  { %s3163_s20 = smov 0   ;;  %s3165_s21 = smov 0  }
   0x7   :  { %s3167_s22 = smov 0   ;;  %s3169_s23 = smov 0  }
   0x8 LB: > { %s2603_s24 = sadd.s32 4294967295, %s3100_s23   ;;  %s2604_s25 = sadd.s32 4294967294, %s3100_s23   ;;  %s3100_s23 = sphi %s3169_s23, %s25_s23   ;;  %s3096_s22 = sphi %s3167_s22, %s3748_s22   ;;  %s3092_s21 = sphi %s3165_s21, %s3747_s21   ;;  %s3088_s20 = sphi %s3163_s20, %s3746_s20   ;;  %s3084_s19 = sphi %s3161_s19, %s3745_s19   ;;  %s3080_s18 = sphi %s3159_s18, %s3744_s18  }
   0x9   : > { %s37_s26 = sadd.s32 1, %s3096_s22  ;;  %s44_s27 = sadd.s32 1, %s3088_s20 }
   0xa   : > { %p39_p0 = scmp.ge.s32.totalorder %s37_s26, 2  ;;  %p51_p1 = scmp.ne.s32.totalorder %s3088_s20, %s3084_s19 }
   0xb   : > { %p52_p2 = scmp.eq.s32.totalorder %s3100_s23, 0  ;;  %p57_p3 = scmp.ne.s32.totalorder %s3084_s19, %s3080_s18 }
   0xc   : > { %s3750_s26 = smov (%p39_p0, %s37_s26), 0  ;;  %p58_p5 = scmp.eq.s32.totalorder %s2603_s24, 0 }
   0xd   : > { %p3200_p4 = por %p52_p2, %p51_p1  ;;  %s41_s29 = ssub.s32 %s3096_s22, %s3750_s26 }
   0xe   : > { %p151_p6 = scmp.eq.s32.totalorder %s2603_s24, 1  ;;  %p42_p7 = scmp.eq.s32.totalorder %s41_s29, 0 }
   0xf   : > { %p3206_p8 = por %p58_p5, %p57_p3  ;;  %p157_p10 = scmp.eq.s32.totalorder %s2604_s25, 1 }
  0x10   : > { %p3210_p9 = por %p151_p6, %p51_p1  ;;  %p2856_p13 = scmp.lt.s32.totalorder %s3100_s23, 2 }
  0x11   : > { %s3215_s7 = scalar_select %p42_p7, %s3088_s20, %s44_s27  }
  0x12   : > { %s3737_s6 = scalar_select %p3210_p9, 1, 0 }
  0x13   : > { %p3217_p11 = por %p157_p10, %p57_p3  ;;  %s216_s9 = sand.u32 1, %s3088_s20  }
  0x14   : > { %s2608_s10 = sshll.u32 %s216_s9, 6  ;;  %s2609_s11 = sshll.u32 %s3096_s22, 7 }
  0x15   : > { %s3738_s8 = scalar_select %p3217_p11, 1, 0 }
  0x16   : > { %s3228_s14 = scalar_lea.hbm %s3727_s0, %s2609_s11  ;;  %s220_s15 = scalar_lea.vmem [#allocation3], %s2608_s10 }
  0x17   : > { %s226_s16 = sshll.u32 %s220_s15, 4  ;;  %p3234_p0 = pnand %p2856_p13, %p3200_p4  ;;  %s3230_s16 = int_to_ptr.vmem [resolvable:$true] %s226_s16 }
  0x18   : > { %s3238_s24 = scalar_lea.sflag [#allocation4], %s216_s9  ;;  %s2956_s25 = scalar_lea.hbm %s3228_s14, 1024 }
  0x19   : > { %p2957_p1 = scmp.ne.s32.totalorder %s3228_s14, %s2956_s25  ;;  %p2958_p2 = pneg %p3234_p0 }
  0x1a   : > { %s2961_s28 = scalar_lea.hbm %s3727_s0, 2048  ;;  %p2962_p4 = scmp.lt.u32.totalorder %s3228_s14, %s3727_s0 }
  0x1b   : > { %p2959_p3 = pnand %p2958_p2, %p2957_p1  ;;  %p2963_p6 = scmp.lt.u32.totalorder %s2961_s28, %s2956_s25 }
  0x1c   : > { %p2965_p10 = scmp.lt.u32.totalorder %s2956_s25, %s3228_s14 }
  0x1d   : > { %p2960_p5 = pneg %p2959_p3  ;;  %p2964_p7 = por %p2963_p6, %p2962_p4 }
  0x1f   : > { %p2966_p13 = por %p2965_p10, %p2964_p7 }
  0x21   : > { %p2967_p12 = pnand %p2966_p13, %p2960_p5 }
  0x23   : > { %2970 = shalt.err (!%p2967_p12)
}
  0x24   : > { %s2971_s9 = scalar_lea.vmem %s3230_s16, 1024  ;;  %s3102_s12 = smov [#allocation3]  }
  0x25   : > { %p2972_p1 = scmp.ne.s32.totalorder %s3230_s16, %s2971_s9  ;;  %s2976_s13 = sshll.u32 %s3102_s12, 4  ;;  %s2977_s13 = int_to_ptr.vmem [resolvable:$false] %s2976_s13 }
  0x26   : > { %s2978_s15 = scalar_lea.vmem %s2977_s13, 2048  ;;  %p2979_p9 = scmp.lt.s32.totalorder %s3230_s16, %s2977_s13 }
  0x27   : > { %p2974_p3 = pnand %p2972_p1, %p2958_p2  ;;  %p2980_p4 = scmp.lt.s32.totalorder %s2978_s15, %s2971_s9 }
  0x29   : > { %p2975_p11 = pneg %p2974_p3  ;;  %p2981_p6 = por %p2980_p4, %p2979_p9 }
  0x2b   : > { %p2982_p7 = pnand %p2981_p6, %p2975_p11 }
  0x2d   : > { %2985 = shalt.err (!%p2982_p7)
}
  0x2e   : > { %s3103_s25 = smov 256   ;;  %s3104_s27 = smov 128  }
  0x2f   : > { %s3105_s29 = smov 8   ;;  %p2610_p12 = scmp.ge.s32.totalorder %s3100_s23, 1 }
  0x30   : > { %2848 = dma.hbm_to_vmem [thread:$0]  (!%p3234_p0), %s3228_s14, 1024, %s3230_s16, %s3238_s24, %s3103_s25, %s3104_s27, %s3105_s29  }
  0x31   : > { %p234_p2 = scmp.lt.s32.totalorder %s3100_s23, 3 }
  0x33   : > { %p235_p5 = pnand %p2610_p12, %p234_p2 }
  0x34   : > { %s3269_s28 = sand.u32 (!%p235_p5), 1, %s3084_s19  }
  0x35   : > { %238 = sbr.rel (%p235_p5) target bundleno = 1307 (0x51b), region = 36  ;;  %s2611_s10 = sshll.u32 (!%p235_p5), %s3269_s28, 6 }
  0x36   : > { %s241_s11 = scalar_lea.sflag (!%p235_p5), [#allocation4], %s3269_s28  ;;  %s244_s9 = scalar_lea.vmem (!%p235_p5), [#allocation3], %s2611_s10 }
  0x3c   : > { %3067 = dma.done.wait (%p3206_p8), %s241_s11, 1024  }
  0x3d   : > { %3069 = vsyncadd (%p3206_p8), %s241_s11, 4294966272  ;;  %v3277_v0 = vld [vmem:[%s244_s9] sm:$0xff]  ;;  %v3279_v1 = vld [vmem:[%s244_s9 + $0x10] sm:$0xff]  ;;  %s3106_s14 = smov 112   ;;  %vm322_vm0 = vcmask 130048   ;;  %v655_v35 = vlaneseq  ;;  %vm456_vm1 = vcmask 261120  }
  0x3e   : > { %306 = vrot.lane.b32.xlu0 %v3277_v0, %s3106_s14  ;;  %310 = vrot.lane.b32.xlu1 %v3279_v1, %s3106_s14  ;;  %v963_v2 = vcombine.low %v3277_v0, %v3279_v1  ;;  %v964_v3 = vcombine.high %v3277_v0, %v3279_v1  ;;  %v3289_v4 = vld [vmem:[%s244_s9 + $0x8] sm:$0xff]  ;;  %v3291_v5 = vld [vmem:[%s244_s9 + $0x18] sm:$0xff]  ;;  %v3107_v33 = vmov 1983009808   ;;  %v3108_v50 = vmov 1934713408  }
  0x3f   : > { %v979_v6 = vcombine.low %v3289_v4, %v3291_v5  ;;  %v980_v7 = vcombine.high %v3289_v4, %v3291_v5  ;;  %v3297_v8 = vld [vmem:[%s244_s9 + $0x20] sm:$0xff]  ;;  %v3299_v9 = vld [vmem:[%s244_s9 + $0x28] sm:$0xff]  ;;  %v294_v10 = vld [vmem:[%s244_s9 + $0x30] sm:$0xff]  ;;  %v653_v34 = vunpack.c.l.s4 %v3107_v33  ;;  %v656_v37 = vshrl.u32 %v655_v35, 7  ;;  %s3111_s30 = smov 44   ;;  %s3112_s16 = smov 4  }
  0x40   : > { %v995_v11 = vcombine.low %v3297_v8, %v294_v10  ;;  %v996_v12 = vcombine.high %v3297_v8, %v294_v10  ;;  %v295_v13 = vld [vmem:[%s244_s9 + $0x38] sm:$0xff]  ;;  %v297_v15 = vld [vmem:[%s3728_s1 + $0x8] sm:$0xff]  ;;  %v454_v30 = vld [vmem:[%s3729_s2 + $0x10] sm:$0xff]  ;;  %v717_v51 = vunpack.c.l.s4 %v3108_v50  ;;  %vm951_vm2 = vcmask 64512   ;;  %s3109_s9 = smov 36   ;;  %s3113_s17 = smov 8  }
  0x41   : > { %v296_v14 = vld [vmem:[%s3728_s1] sm:$0xff]  ;;  %v1011_v16 = vcombine.low %v3299_v9, %v295_v13  ;;  %v1012_v17 = vcombine.high %v3299_v9, %v295_v13  ;;  %v453_v19 = vld [vmem:[%s3729_s2 + $0x8] sm:$0xff]  ;;  %v455_v31 = vld [vmem:[%s3729_s2 + $0x18] sm:$0xff]  ;;  %v654_v36 = vunpack.c.0.s8 %v653_v34  ;;  %vm586_vm3 = vcmask 31744   ;;  %s3114_s24 = smov 40   ;;  %s3115_s12 = smov 12  }
  0x42   : > { %v452_v18 = vld [vmem:[%s3729_s2] sm:$0xff]  ;;  %308 = vrot.lane.b32.xlu0 %v3289_v4, %s3106_s14  ;;  %312 = vrot.lane.b32.xlu1 %v3291_v5, %s3106_s14  ;;  %v2811_v20 = vpack.c.bf16 %v297_v15, %v296_v14  ;;  %v2819_v32 = vpack.c.bf16 %v455_v31, %v454_v30  ;;  %v718_v57 = vunpack.c.0.s8 %v717_v51  ;;  %s3734_s13 = smov 24   ;;  %s3118_s10 = smov 16   ;;  %vm3124_vm4 = vmmov 0  }
  0x43   : > { %v2815_v21 = vpack.c.bf16 %v453_v19, %v452_v18  ;;  %v3341_v38 = vsub.s32 %v654_v36, %v656_v37  ;;  %s3119_s11 = smov 48   ;;  %s3120_s15 = smov 20   ;;  %vm953_vm5 = vcmask 97280   ;;  %vm956_vm6 = vcmask 162816  }
  0x44   : > { %2812 = vmatprep.subr.bf16.mxu0 %v2811_v20  ;;  %v3354_v58 = vsub.s32 %v718_v57, %v656_v37  ;;  %s3121_s25 = smov 56   ;;  %s3126_s27 = smov 60   ;;  %vm958_vm7 = vcmask 195584   ;;  %vm960_vm8 = vcmask 228352   ;;  %vm2343_vm9 = vcmask 293888  }
  0x45   : > { %2814 = vmatpush3.bf16.msra.mxu0 %v2811_v20  ;;  %2835 = vmatprep.subr.bf16.mxu1 %v2815_v21  ;;  %v971_v39 = vrot.slane %v963_v2, %v3341_v38  ;;  %v987_v40 = vrot.slane %v979_v6, %v3341_v38  ;;  %v1003_v41 = vrot.slane %v995_v11, %v3341_v38  ;;  %vm2345_vm10 = vcmask 326656   ;;  %p3741_p9 = scmp.ne.s32.totalorder %s3737_s6, 0 }
  0x46   : > { %314 = vrot.lane.b32.xlu0 %v3297_v8, %s3106_s14  ;;  %316 = vrot.lane.b32.xlu1 %v3299_v9, %s3106_s14  ;;  %v1019_v42 = vrot.slane %v1011_v16, %v3341_v38  ;;  %v978_v43 = vrot.slane %v964_v3, %v3341_v38  ;;  %v994_v44 = vrot.slane %v980_v7, %v3341_v38  ;;  %vm2347_vm11 = vcmask 359424  }
  0x47   : > { %2816 = vmatprep.subr.bf16.mxu0 %v2815_v21  ;;  %2837 = vmatpush3.bf16.msra.mxu1 %v2815_v21  ;;  %v1010_v45 = vrot.slane %v996_v12, %v3341_v38  ;;  %v1026_v46 = vrot.slane %v1012_v17, %v3341_v38  ;;  %v1027_v47 = vcombine.low %v971_v39, %v987_v40  ;;  %vm2349_vm12 = vcmask 392192  }
  0x48   : > { %2836 = vmatprep.subr.bf16.mxu1 %v2819_v32  ;;  %v1059_v48 = vcombine.low %v1003_v41, %v1019_v42  ;;  %v1028_v49 = vcombine.high %v971_v39, %v987_v40  ;;  %v1060_v52 = vcombine.high %v1003_v41, %v1019_v42  ;;  %v1043_v53 = vcombine.low %v978_v43, %v994_v44 }
  0x49   : > { %v1075_v54 = vcombine.low %v1010_v45, %v1026_v46  ;;  %v1044_v55 = vcombine.high %v978_v43, %v994_v44  ;;  %v1076_v56 = vcombine.high %v1010_v45, %v1026_v46  ;;  %v1035_v59 = vrot.slane %v1027_v47, %v3354_v58 }
  0x4a   : > { %318 = vrot.lane.b32.xlu0 %v294_v10, %s3106_s14  ;;  %320 = vrot.lane.b32.xlu1 %v295_v13, %s3106_s14  ;;  %v1067_v60 = vrot.slane %v1059_v48, %v3354_v58  ;;  %v1042_v61 = vrot.slane %v1028_v49, %v3354_v58  ;;  %v1074_v62 = vrot.slane %v1060_v52, %v3354_v58  ;;  %s3110_s14 = smov 32   ;;  %vm2351_vm13 = vcmask 424960  }
  0x4b   : > { %2838 = vmatpush3.bf16.msra.mxu1 %v2819_v32  ;;  %v1051_v63 = vrot.slane %v1043_v53, %v3354_v58  ;;  %v1083_v0 = vrot.slane %v1075_v54, %v3354_v58  ;;  %v1058_v1 = vrot.slane %v1044_v55, %v3354_v58  ;;  %v1090_v2 = vrot.slane %v1076_v56, %v3354_v58 }
  0x4c   : > { %v1091_v3 = vcombine.low %v1035_v59, %v1067_v60  ;;  %v1093_v4 = vcombine.low %v1042_v61, %v1074_v62  ;;  %v1094_v5 = vcombine.high %v1042_v61, %v1074_v62  ;;  %v1092_v6 = vcombine.high %v1035_v59, %v1067_v60 }
  0x4d   : > { %v1095_v7 = vcombine.low %v1051_v63, %v1083_v0  ;;  %v1096_v8 = vcombine.high %v1051_v63, %v1083_v0  ;;  %v1097_v9 = vcombine.low %v1058_v1, %v1090_v2  ;;  %v1098_v10 = vcombine.high %v1058_v1, %v1090_v2 }
  0x4e   : > { %vm2353_vm14 = vcmask 457728   ;;  %vm2355_vm15 = vcmask 490496  }
  0x68   : > { %1099 = vxpose.xlu0.b32.start.end [1/1] (short) (narrow) %v1091_v3, 16 }
  0x6d   : > { %1325 = vxpose.xlu0.b32.start.end [1/1] (short) (narrow) %v1093_v4, 16 }
  0x72   : > { %1438 = vxpose.xlu0.b32.start.end [1/1] (short) (narrow) %v1094_v5, 16 }
  0x73   : > { %1212 = vxpose.xlu1.b32.start.end [1/1] (short) (narrow) %v1092_v6, 16 }
  0x77   : > { %1551 = vxpose.xlu0.b32.start.end [1/1] (short) (narrow) %v1095_v7, 16 }
  0x78   : > { %1664 = vxpose.xlu1.b32.start.end [1/1] (short) (narrow) %v1096_v8, 16 }
  0x7c   : > { %1777 = vxpose.xlu0.b32.start.end [1/1] (short) (narrow) %v1097_v9, 16 }
  0x7d   : > { %1890 = vxpose.xlu1.b32.start.end [1/1] (short) (narrow) %v1098_v10, 16 }
  0xb0   : > { %v307_v22 = vpop.permute.xlu0 %306  ;;  %v311_v23 = vpop.permute.xlu1 %310 }
  0xb1   : > { %2720 = vmatprep.mubr.msk.f32.mxu0 %vm322_vm0, %v307_v22 }
  0xb4   : > { %v309_v24 = vpop.permute.xlu0 %308  ;;  %v313_v25 = vpop.permute.xlu1 %312 }
  0xb5   : > { %2721 = vmatmul.mubr.msk.f32.vlgmr.msra.gmra.mrb[0].mxu0 %vm322_vm0, %v309_v24 }
  0xb6   : > { %2723 = vmatprep.mubr.msk.f32.mxu0 %vm322_vm0, %v311_v23  ;;  %2818 = vmatpush3.bf16.msra.mxu0 %v2815_v21 }
  0xb7   : > { %2820 = vmatprep.subr.bf16.mxu0 %v2819_v32 }
  0xb8   : > { %v315_v26 = vpop.permute.xlu0 %314  ;;  %v317_v27 = vpop.permute.xlu1 %316 }
  0xb9   : > { %2724 = vmatmul.mubr.msk.f32.gmra.mrb[2].mxu0 %vm322_vm0, %v313_v25 }
  0xba   : > { %2726 = vmatprep.mubr.msk.f32.mxu0 %vm322_vm0, %v315_v26  ;;  %2822 = vmatpush3.bf16.msra.mxu0 %v2819_v32 }
  0xbc   : > { %v319_v28 = vpop.permute.xlu0 %318  ;;  %v321_v29 = vpop.permute.xlu1 %320 }
  0xbd   : > { %2727 = vmatmul.mubr.msk.f32.gmra.mrb[4].mxu0 %vm322_vm0, %v317_v27 }
  0xbe   : > { %2729 = vmatprep.mubr.msk.f32.mxu0 %vm322_vm0, %v319_v28 }
  0xc1   : > { %2730 = vmatmul.mubr.msk.f32.gmra.mrb[6].mxu0 %vm322_vm0, %v321_v29 }
  0xe8   : > { %v1115_v27 = vpop.trf.xlu0 }
  0xec   : > { %v3372_v28 = vpop.trf.xlu0 }
  0xf0   : > { %v1341_v29 = vpop.trf.xlu0 }
 0x188   : > { %v2722_v11 = vpop.f32.mrb[0].mxu0 }
 0x189   : > { %v405_v12 = vpop.f32.mrb[1].mxu0  ;;  %v445_v14 = vmax.f32 %v2722_v11, 0.0 }
 0x18a   : > { %v444_v13 = vmax.f32 %v405_v12, 0.0 }
 0x18c   : > { %v2725_v15 = vpop.f32.mrb[2].mxu0  ;;  %2740 = vmatprep.mubr.msk.f32.mxu0 %vm456_vm1, %v444_v13 }
 0x18d   : > { %v415_v16 = vpop.f32.mrb[3].mxu0  ;;  %2741 = vmatmul.mubr.msk.f32.vlgmr.msra.gmra.mrb[8].mxu0 %vm456_vm1, %v445_v14  ;;  %v447_v18 = vmax.f32 %v2725_v15, 0.0 }
 0x18e   : > { %v446_v17 = vmax.f32 %v415_v16, 0.0  ;;  %2754 = vmatprep.mubr.msk.f32.mxu0 %vm951_vm2, %v1115_v27 }
 0x190   : > { %v2728_v19 = vpop.f32.mrb[4].mxu0  ;;  %2743 = vmatprep.mubr.msk.f32.mxu1 %vm456_vm1, %v446_v17 }
 0x191   : > { %v425_v20 = vpop.f32.mrb[5].mxu0  ;;  %2744 = vmatmul.mubr.msk.f32.vlgmr.msra.gmra.mrb[0].mxu1 %vm456_vm1, %v447_v18  ;;  %v449_v22 = vmax.f32 %v2728_v19, 0.0 }
 0x192   : > { %v448_v21 = vmax.f32 %v425_v20, 0.0 }
 0x194   : > { %v2731_v23 = vpop.f32.mrb[6].mxu0  ;;  %2746 = vmatprep.mubr.msk.f32.mxu1 %vm456_vm1, %v448_v21 }
 0x195   : > { %v435_v24 = vpop.f32.mrb[7].mxu0  ;;  %2747 = vmatmul.mubr.msk.f32.gmra.mrb[2].mxu1 %vm456_vm1, %v449_v22  ;;  %v451_v26 = vmax.f32 %v2731_v23, 0.0 }
 0x196   : > { %v450_v25 = vmax.f32 %v435_v24, 0.0 }
 0x198   : > { %2749 = vmatprep.mubr.msk.f32.mxu1 %vm456_vm1, %v450_v25 }
 0x199   : > { %2750 = vmatmul.mubr.msk.f32.gmra.mrb[4].mxu1 %vm456_vm1, %v451_v26 }
 0x19a   : > { %2764 = vmatprep.mubr.msk.f32.mxu1 %vm951_vm2, %v1341_v29  ;;  %v3391_v29 = vpop.trf.xlu0 }
 0x260   : > { %v2742_v30 = vpop.f32.mrb[8].mxu0 }
 0x261   : > { %v547_v31 = vpop.f32.mrb[9].mxu0  ;;  %v588_v35 = vsel %vm586_vm3, %v2742_v30, -inf }
 0x262   : > { %v587_v39 = vsel %vm586_vm3, %v547_v31, -inf }
 0x264   : > { %v2745_v32 = vpop.f32.mrb[0].mxu1 }
 0x265   : > { %v557_v33 = vpop.f32.mrb[1].mxu1  ;;  %v590_v44 = vsel %vm586_vm3, %v2745_v32, -inf }
 0x266   : > { %v589_v48 = vsel %vm586_vm3, %v557_v33, -inf }
 0x268   : > { %v2748_v34 = vpop.f32.mrb[2].mxu1 }
 0x269   : > { %v593_v36 = vsel %vm586_vm3, %v2748_v34, -inf  ;;  %v567_v37 = vpop.f32.mrb[3].mxu1 }
 0x26a   : > { %v594_v40 = vmax.f32 %v588_v35, %v593_v36  ;;  %v591_v41 = vsel %vm586_vm3, %v567_v37, -inf  ;;  %v3398_v35 = vpop.trf.xlu1 }
 0x26b   : > { %v592_v42 = vmax.f32 %v587_v39, %v591_v41 }
 0x26c   : > { %v2751_v43 = vpop.f32.mrb[4].mxu1 }
 0x26d   : > { %v599_v45 = vmax.f32 %v592_v42, %v594_v40  ;;  %v597_v46 = vsel %vm586_vm3, %v2751_v43, -inf  ;;  %v577_v47 = vpop.f32.mrb[5].mxu1 }
 0x26e   : > { %v598_v49 = vmax.f32 %v590_v44, %v597_v46  ;;  %v595_v50 = vsel %vm586_vm3, %v577_v47, -inf }
 0x26f   : > { %v596_v51 = vmax.f32 %v589_v48, %v595_v50 }
 0x271   : > { %v600_v52 = vmax.f32 %v596_v51, %v598_v49 }
 0x273   : > { %v601_v53 = vmax.f32 %v599_v45, %v600_v52 }
 0x275   : > { %v602_v54 = vsub.f32 %v547_v31, %v601_v53  ;;  %v603_v55 = vsub.f32 %v2742_v30, %v601_v53  ;;  %v604_v56 = vsub.f32 %v557_v33, %v601_v53  ;;  %v605_v57 = vsub.f32 %v2745_v32, %v601_v53  ;;  %v3394_v32 = vpop.trf.xlu0 }
 0x276   : > { %v606_v59 = vsub.f32 %v567_v37, %v601_v53  ;;  %v607_v60 = vsub.f32 %v2748_v34, %v601_v53  ;;  %v608_v61 = vsub.f32 %v577_v47, %v601_v53  ;;  %v609_v62 = vsub.f32 %v2751_v43, %v601_v53 }
 0x277   : > { %v610_v63 = vmul.f32 1.442695, %v602_v54  ;;  %v612_v0 = vmul.f32 1.442695, %v603_v55  ;;  %v614_v1 = vmul.f32 1.442695, %v604_v56 }
 0x278   : > { %v616_v2 = vmul.f32 1.442695, %v605_v57  ;;  %v618_v3 = vmul.f32 1.442695, %v606_v59  ;;  %v620_v4 = vmul.f32 1.442695, %v607_v60  ;;  %v3407_v60 = vpop.trf.xlu1 }
 0x279   : > { %2938 = vpow2.f32 %v610_v63  ;;  %v622_v5 = vmul.f32 1.442695, %v608_v61  ;;  %v624_v6 = vmul.f32 1.442695, %v609_v62  ;;  %v3396_v33 = vpop.trf.xlu0 }
 0x27a   : > { %2940 = vpow2.f32 %v612_v0 }
 0x27b   : > { %2942 = vpow2.f32 %v614_v1 }
 0x27c   : > { %2944 = vpow2.f32 %v616_v2 }
 0x27d   : > { %2946 = vpow2.f32 %v618_v3  ;;  %v3400_v47 = vpop.trf.xlu0 }
 0x27e   : > { %2948 = vpow2.f32 %v620_v4 }
 0x27f   : > { %2950 = vpow2.f32 %v622_v5 }
 0x280   : > { %2952 = vpow2.f32 %v624_v6 }
 0x283   : > { %v2939_v7 = vpop.eup %2938 }
 0x284   : > { %v2941_v8 = vpop.eup %2940  ;;  %v626_v9 = vsel %vm586_vm3, %v2939_v7, 0.0 }
 0x285   : > { %v2943_v10 = vpop.eup %2942  ;;  %v627_v11 = vsel %vm586_vm3, %v2941_v8, 0.0 }
 0x286   : > { %v2945_v12 = vpop.eup %2944  ;;  %v628_v13 = vadd.f32 %v627_v11, %v626_v9  ;;  %v629_v14 = vsel %vm586_vm3, %v2943_v10, 0.0 }
 0x287   : > { %v2947_v15 = vpop.eup %2946  ;;  %v631_v17 = vsel %vm586_vm3, %v2945_v12, 0.0 }
 0x288   : > { %v630_v16 = vadd.f32 %v629_v14, %v628_v13  ;;  %v2949_v18 = vpop.eup %2948  ;;  %v633_v20 = vsel %vm586_vm3, %v2947_v15, 0.0 }
 0x289   : > { %v2951_v21 = vpop.eup %2950  ;;  %v635_v23 = vsel %vm586_vm3, %v2949_v18, 0.0 }
 0x28a   : > { %v632_v19 = vadd.f32 %v631_v17, %v630_v16  ;;  %v2953_v24 = vpop.eup %2952  ;;  %v637_v26 = vsel %vm586_vm3, %v2951_v21, 0.0 }
 0x28b   : > { %v639_v30 = vsel %vm586_vm3, %v2953_v24, 0.0 }
 0x28c   : > { %v634_v22 = vadd.f32 %v633_v20, %v632_v19 }
 0x28e   : > { %v636_v25 = vadd.f32 %v635_v23, %v634_v22 }
 0x290   : > { %v638_v27 = vadd.f32 %v637_v26, %v636_v25 }
 0x292   : > { %v640_v31 = vadd.f32 %v639_v30, %v638_v27 }
 0x294   : > { %2954 = vrcp.f32 %v640_v31 }
 0x29e   : > { %v2955_v34 = vpop.eup %2954 }
 0x29f   : > { %v646_v36 = vmul.f32 %v2955_v34, %v2947_v15  ;;  %v648_v37 = vmul.f32 %v2955_v34, %v2951_v21  ;;  %v642_v39 = vmul.f32 %v2955_v34, %v2939_v7  ;;  %v643_v40 = vmul.f32 %v2955_v34, %v2941_v8  ;;  %v3420_v21 = vpop.trf.xlu1 }
 0x2a0   : > { %v644_v41 = vmul.f32 %v2955_v34, %v2943_v10  ;;  %v645_v42 = vmul.f32 %v2955_v34, %v2945_v12  ;;  %v647_v43 = vmul.f32 %v2955_v34, %v2949_v18  ;;  %v649_v44 = vmul.f32 %v2955_v34, %v2953_v24  ;;  %v1568_v12 = vpop.trf.xlu0 }
 0x2a1   : > { %v682_v45 = vcombine.low %v646_v36, %v648_v37  ;;  %v683_v46 = vcombine.high %v646_v36, %v648_v37 }
 0x2a2   : > { %v650_v48 = vcombine.low %v642_v39, %v644_v41  ;;  %v666_v49 = vcombine.low %v643_v40, %v645_v42  ;;  %v698_v50 = vcombine.low %v647_v43, %v649_v44  ;;  %v651_v51 = vcombine.high %v642_v39, %v644_v41 }
 0x2a3   : > { %v690_v52 = vrot.slane %v682_v45, %v3341_v38  ;;  %v667_v53 = vcombine.high %v643_v40, %v645_v42  ;;  %v697_v54 = vrot.slane %v683_v46, %v3341_v38  ;;  %v699_v55 = vcombine.high %v647_v43, %v649_v44 }
 0x2a4   : > { %v658_v56 = vrot.slane %v650_v48, %v3341_v38  ;;  %v674_v57 = vrot.slane %v666_v49, %v3341_v38  ;;  %v706_v59 = vrot.slane %v698_v50, %v3341_v38  ;;  %v665_v61 = vrot.slane %v651_v51, %v3341_v38  ;;  %v1793_v37 = vpop.trf.xlu0 }
 0x2a5   : > { %v681_v62 = vrot.slane %v667_v53, %v3341_v38  ;;  %v713_v63 = vrot.slane %v699_v55, %v3341_v38 }
 0x2a6   : > { %v714_v0 = vcombine.low %v658_v56, %v674_v57  ;;  %v746_v1 = vcombine.low %v690_v52, %v706_v59  ;;  %v715_v2 = vcombine.high %v658_v56, %v674_v57  ;;  %v747_v3 = vcombine.high %v690_v52, %v706_v59 }
 0x2a7   : > { %v730_v4 = vcombine.low %v665_v61, %v681_v62  ;;  %v762_v5 = vcombine.low %v697_v54, %v713_v63  ;;  %v731_v6 = vcombine.high %v665_v61, %v681_v62  ;;  %v763_v7 = vcombine.high %v697_v54, %v713_v63 }
 0x2a8   : > { %v722_v8 = vrot.slane %v714_v0, %v3354_v58  ;;  %v754_v9 = vrot.slane %v746_v1, %v3354_v58  ;;  %v729_v10 = vrot.slane %v715_v2, %v3354_v58  ;;  %v761_v11 = vrot.slane %v747_v3, %v3354_v58  ;;  %v1794_v55 = vpop.trf.xlu0 }
 0x2a9   : > { %v738_v13 = vrot.slane %v730_v4, %v3354_v58  ;;  %v770_v14 = vrot.slane %v762_v5, %v3354_v58  ;;  %v745_v15 = vrot.slane %v731_v6, %v3354_v58  ;;  %v777_v16 = vrot.slane %v763_v7, %v3354_v58 }
 0x2aa   : > { %v778_v17 = vcombine.low %v722_v8, %v754_v9  ;;  %v780_v18 = vcombine.low %v729_v10, %v761_v11  ;;  %v779_v19 = vcombine.high %v722_v8, %v754_v9  ;;  %v781_v20 = vcombine.high %v729_v10, %v761_v11 }
 0x2ab   : > { %v782_v22 = vcombine.low %v738_v13, %v770_v14  ;;  %v784_v23 = vcombine.low %v745_v15, %v777_v16  ;;  %v3422_v24 = vcombine.high %v738_v13, %v770_v14  ;;  %v3424_v25 = vcombine.high %v745_v15, %v777_v16 }
 0x2ac   : > { %2752 = vmatprep.subr.mxu0 %v778_v17  ;;  %2762 = vmatprep.subr.mxu1 %v780_v18  ;;  %v2630_v26 = vcombine.low %v722_v8, %v729_v10  ;;  %v2632_v27 = vcombine.high %v722_v8, %v729_v10  ;;  %v2634_v30 = vcombine.low %v738_v13, %v745_v15 }
 0x2ad   : > { %2753 = vmatpush3.msra.mxu0 %v778_v17  ;;  %2763 = vmatpush3.msra.mxu1 %v780_v18  ;;  %v2636_v31 = vcombine.high %v738_v13, %v745_v15  ;;  %v2631_v34 = vcombine.low %v754_v9, %v761_v11  ;;  %v2633_v36 = vcombine.high %v754_v9, %v761_v11 }
 0x2ae   : > { %2755 = vmatmul.mubr.msk.f32.vlgmr.msra.gmra.mrb[10].mxu0 %vm951_vm2, %v3372_v28  ;;  %2757 = vmatprep.subr.mxu0 %v779_v19  ;;  %v794_v39 = vrot.slane %v2630_v26, %v3341_v38  ;;  %v810_v40 = vrot.slane %v2632_v27, %v3341_v38  ;;  %v826_v41 = vrot.slane %v2634_v30, %v3341_v38  ;;  %v1681_v28 = vpop.trf.xlu1 }
 0x2af   : > { %2765 = vmatmul.mubr.msk.f32.vlgmr.msra.gmra.mrb[6].mxu1 %vm951_vm2, %v3391_v29  ;;  %2772 = vmatprep.subr.mxu1 %v782_v22  ;;  %v842_v42 = vrot.slane %v2636_v31, %v3341_v38  ;;  %v801_v43 = vrot.slane %v2631_v34, %v3341_v38  ;;  %v817_v44 = vrot.slane %v2633_v36, %v3341_v38 }
 0x2b0   : > { %2758 = vmatpush3.msra.mxu0 %v779_v19  ;;  %2759 = vmatprep.mubr.msk.f32.mxu0 %vm951_vm2, %v3398_v35  ;;  %v850_v45 = vcombine.low %v794_v39, %v810_v40  ;;  %v851_v46 = vcombine.high %v794_v39, %v810_v40  ;;  %v2635_v48 = vcombine.low %v770_v14, %v777_v16 }
 0x2b1   : > { %2773 = vmatpush3.msra.mxu1 %v782_v22  ;;  %2767 = vmatprep.subr.mxu0 %v781_v20  ;;  %v882_v49 = vcombine.low %v826_v41, %v842_v42  ;;  %v883_v50 = vcombine.high %v826_v41, %v842_v42  ;;  %v2637_v29 = vcombine.high %v770_v14, %v777_v16 }
 0x2b2   : > { %2782 = vmatprep.subr.mxu1 %v784_v23  ;;  %2774 = vmatprep.mubr.msk.f32.mxu1 %vm951_vm2, %v3400_v47  ;;  %v3441_v51 = vrot.slane %v850_v45, %v3354_v58  ;;  %v3444_v52 = vrot.slane %v851_v46, %v3354_v58  ;;  %v833_v35 = vrot.slane %v2635_v48, %v3341_v38  ;;  %v1906_v62 = vpop.trf.xlu1 }
 0x2b3   : > { %2760 = vmatmul.mubr.msk.f32.vlgmr.msra.gmra.mrb[12].mxu0 %vm951_vm2, %v3407_v60  ;;  %2775 = vmatmul.mubr.msk.f32.vlgmr.msra.gmra.mrb[8].mxu1 %vm951_vm2, %v1568_v12  ;;  %v3451_v53 = vrot.slane %v882_v49, %v3354_v58  ;;  %v3454_v54 = vrot.slane %v883_v50, %v3354_v58  ;;  %v849_v47 = vrot.slane %v2637_v29, %v3341_v38 }
 0x2b4   : > { %2768 = vmatpush3.msra.mxu0 %v781_v20  ;;  %2783 = vmatpush3.msra.mxu1 %v784_v23  ;;  %v866_v56 = vcombine.low %v801_v43, %v817_v44  ;;  %v867_v57 = vcombine.high %v801_v43, %v817_v44 }
 0x2b5   : > { %2769 = vmatprep.mubr.msk.f32.mxu0 %vm951_vm2, %v3394_v32  ;;  %2777 = vmatprep.subr.mxu0 %v3422_v24  ;;  %v915_v59 = vcombine.high %v3441_v51, %v3451_v53  ;;  %v917_v60 = vcombine.high %v3444_v52, %v3454_v54  ;;  %v898_v61 = vcombine.low %v833_v35, %v849_v47 }
 0x2b6   : > { %2784 = vmatprep.mubr.msk.f32.mxu1 %vm951_vm2, %v1793_v37  ;;  %v3466_v63 = vrot.slane %v866_v56, %v3354_v58  ;;  %v916_v0 = vcombine.low %v3444_v52, %v3454_v54  ;;  %v3471_v32 = vrot.slane %v867_v57, %v3354_v58  ;;  %v899_v1 = vcombine.high %v833_v35, %v849_v47  ;;  %v1907_v8 = vpop.trf.xlu1 }
 0x2b7   : > { %2770 = vmatmul.mubr.msk.f32.vlgmr.msra.gmra.mrb[14].mxu0 %vm951_vm2, %v3396_v33  ;;  %2785 = vmatmul.mubr.msk.f32.vlgmr.msra.gmra.mrb[10].mxu1 %vm951_vm2, %v1794_v55  ;;  %v3477_v2 = vrot.slane %v898_v61, %v3354_v58  ;;  %v914_v3 = vcombine.low %v3441_v51, %v3451_v53 }
 0x2b8   : > { %2778 = vmatpush3.msra.mxu0 %v3422_v24  ;;  %2779 = vmatprep.mubr.msk.f32.mxu0 %vm951_vm2, %v3420_v21  ;;  %v3485_v4 = vrot.slane %v899_v1, %v3354_v58 }
 0x2b9   : > { %2787 = vmatprep.subr.mxu0 %v3424_v25  ;;  %v919_v33 = vcombine.high %v3466_v63, %v3477_v2  ;;  %v918_v5 = vcombine.low %v3466_v63, %v3477_v2 }
 0x2ba   : > { %v921_v6 = vcombine.high %v3471_v32, %v3485_v4  ;;  %v920_v7 = vcombine.low %v3471_v32, %v3485_v4 }
 0x2bb   : > { %2780 = vmatmul.mubr.msk.f32.vlgmr.msra.gmra.mrb[16].mxu0 %vm951_vm2, %v1681_v28 }
 0x2bc   : > { %2788 = vmatpush3.msra.mxu0 %v3424_v25  ;;  %2789 = vmatprep.mubr.msk.f32.mxu0 %vm951_vm2, %v1906_v62 }
 0x2bf   : > { %2790 = vmatmul.mubr.msk.f32.vlgmr.msra.gmra.mrb[18].mxu0 %vm951_vm2, %v1907_v8 }
 0x381   : > { %v2756_v9 = vpop.f32.mrb[10].mxu0 }
 0x382   : > { %v2766_v10 = vpop.f32.mrb[6].mxu1  ;;  %v1203_v11 = vpop.f32.mrb[11].mxu0 }
 0x383   : > { %v2139_v12 = vcombine.low %v2756_v9, %v2766_v10  ;;  %v2140_v13 = vcombine.high %v2756_v9, %v2766_v10  ;;  %v1429_v14 = vpop.f32.mrb[7].mxu1 }
 0x384   : > { %v2003_v15 = vcombine.low %v1203_v11, %v1429_v14  ;;  %v2004_v16 = vcombine.high %v1203_v11, %v1429_v14 }
 0x385   : > { %v2147_v39 = vrot.slane %v2139_v12, %v3341_v38  ;;  %v2154_v40 = vrot.slane %v2140_v13, %v3341_v38 }
 0x386   : > { %v2761_v17 = vpop.f32.mrb[12].mxu0  ;;  %v2776_v18 = vpop.f32.mrb[8].mxu1  ;;  %v2011_v43 = vrot.slane %v2003_v15, %v3341_v38  ;;  %v2018_v44 = vrot.slane %v2004_v16, %v3341_v38 }
 0x387   : > { %v1316_v19 = vpop.f32.mrb[13].mxu0  ;;  %v1655_v20 = vpop.f32.mrb[9].mxu1 }
 0x38a   : > { %v2771_v21 = vpop.f32.mrb[14].mxu0  ;;  %v2786_v22 = vpop.f32.mrb[10].mxu1 }
 0x38b   : > { %v2155_v23 = vcombine.low %v2761_v17, %v2771_v21  ;;  %v2156_v24 = vcombine.high %v2761_v17, %v2771_v21  ;;  %v1542_v25 = vpop.f32.mrb[15].mxu0  ;;  %v2171_v26 = vcombine.low %v2776_v18, %v2786_v22  ;;  %v2172_v27 = vcombine.high %v2776_v18, %v2786_v22  ;;  %v1881_v30 = vpop.f32.mrb[11].mxu1 }
 0x38c   : > { %v2019_v31 = vcombine.low %v1316_v19, %v1542_v25  ;;  %v2020_v34 = vcombine.high %v1316_v19, %v1542_v25  ;;  %v2035_v36 = vcombine.low %v1655_v20, %v1881_v30  ;;  %v2036_v37 = vcombine.high %v1655_v20, %v1881_v30 }
 0x38d   : > { %v2163_v41 = vrot.slane %v2155_v23, %v3341_v38  ;;  %v2170_v42 = vrot.slane %v2156_v24, %v3341_v38  ;;  %v2179_v61 = vrot.slane %v2171_v26, %v3341_v38  ;;  %v2186_v62 = vrot.slane %v2172_v27, %v3341_v38 }
 0x38e   : > { %v2027_v28 = vrot.slane %v2019_v31, %v3341_v38  ;;  %v2034_v45 = vrot.slane %v2020_v34, %v3341_v38  ;;  %v2781_v46 = vpop.f32.mrb[16].mxu0  ;;  %v2043_v1 = vrot.slane %v2035_v36, %v3341_v38  ;;  %v2050_v8 = vrot.slane %v2036_v37, %v3341_v38 }
 0x38f   : > { %v2203_v48 = vcombine.low %v2147_v39, %v2163_v41  ;;  %v2204_v49 = vcombine.high %v2147_v39, %v2163_v41  ;;  %v2219_v50 = vcombine.low %v2154_v40, %v2170_v42  ;;  %v2220_v29 = vcombine.high %v2154_v40, %v2170_v42  ;;  %v1768_v35 = vpop.f32.mrb[17].mxu0 }
 0x390   : > { %v2067_v47 = vcombine.low %v2011_v43, %v2027_v28  ;;  %v2068_v55 = vcombine.high %v2011_v43, %v2027_v28  ;;  %v2083_v56 = vcombine.low %v2018_v44, %v2034_v45  ;;  %v2084_v57 = vcombine.high %v2018_v44, %v2034_v45 }
 0x391   : > { %v2211_v13 = vrot.slane %v2203_v48, %v3354_v58  ;;  %v2218_v14 = vrot.slane %v2204_v49, %v3354_v58  ;;  %v3515_v17 = vrot.slane %v2219_v50, %v3354_v58  ;;  %v3518_v18 = vrot.slane %v2220_v29, %v3354_v58 }
 0x392   : > { %v2791_v9 = vpop.f32.mrb[18].mxu0  ;;  %v3523_v21 = vrot.slane %v2067_v47, %v3354_v58  ;;  %v2082_v22 = vrot.slane %v2068_v55, %v3354_v58  ;;  %v3529_v25 = vrot.slane %v2084_v57, %v3354_v58  ;;  %v3532_v26 = vrot.slane %v2083_v56, %v3354_v58 }
 0x393   : > { %v2187_v10 = vcombine.low %v2781_v46, %v2791_v9  ;;  %v2188_v11 = vcombine.high %v2781_v46, %v2791_v9  ;;  %v1994_v12 = vpop.f32.mrb[19].mxu0 }
 0x394   : > { %v2051_v15 = vcombine.low %v1768_v35, %v1994_v12  ;;  %v2052_v16 = vcombine.high %v1768_v35, %v1994_v12  ;;  %v2361_v12 = vld [vmem:[%s3730_s3 + $0x8] sm:$0xff] }
 0x395   : > { %v2195_v19 = vrot.slane %v2187_v10, %v3341_v38  ;;  %v2202_v20 = vrot.slane %v2188_v11, %v3341_v38  ;;  %v2360_v11 = vld [vmem:[%s3730_s3] sm:$0xff] }
 0x396   : > { %v2059_v23 = vrot.slane %v2051_v15, %v3341_v38  ;;  %v2066_v24 = vrot.slane %v2052_v16, %v3341_v38  ;;  %v2362_v15 = vld [vmem:[%s3730_s3 + $0x10] sm:$0xff]  ;;  %v2363_v16 = vld [vmem:[%s3730_s3 + $0x18] sm:$0xff] }
 0x397   : > { %v2235_v27 = vcombine.low %v2179_v61, %v2195_v19  ;;  %v2236_v30 = vcombine.high %v2179_v61, %v2195_v19  ;;  %v2251_v31 = vcombine.low %v2186_v62, %v2202_v20  ;;  %v2252_v34 = vcombine.high %v2186_v62, %v2202_v20  ;;  %v2365_v19 = vld [vmem:[%s3730_s3 + $0x28] sm:$0xff] }
 0x398   : > { %v2099_v36 = vcombine.low %v2043_v1, %v2059_v23  ;;  %v2100_v37 = vcombine.high %v2043_v1, %v2059_v23  ;;  %v2115_v39 = vcombine.low %v2050_v8, %v2066_v24  ;;  %v2116_v40 = vcombine.high %v2050_v8, %v2066_v24  ;;  %v2367_v23 = vld [vmem:[%s3730_s3 + $0x38] sm:$0xff] }
 0x399   : > { %v2243_v41 = vrot.slane %v2235_v27, %v3354_v58  ;;  %v2250_v42 = vrot.slane %v2236_v30, %v3354_v58  ;;  %v3537_v38 = vrot.slane %v2251_v31, %v3354_v58  ;;  %v3540_v43 = vrot.slane %v2252_v34, %v3354_v58 }
 0x39a   : > { %v3543_v44 = vrot.slane %v2099_v36, %v3354_v58  ;;  %v2114_v28 = vrot.slane %v2100_v37, %v3354_v58  ;;  %v2130_v45 = vrot.slane %v2116_v40, %v3354_v58  ;;  %v2123_v46 = vrot.slane %v2115_v39, %v3354_v58 }
 0x39b   : > { %v2268_v48 = vcombine.high %v2211_v13, %v2243_v41  ;;  %v2267_v49 = vcombine.low %v2211_v13, %v2243_v41  ;;  %v2270_v50 = vcombine.high %v2218_v14, %v2250_v42  ;;  %v2269_v29 = vcombine.low %v2218_v14, %v2250_v42 }
 0x39c   : > { %v2132_v35 = vcombine.high %v3523_v21, %v3543_v44  ;;  %v2133_v47 = vcombine.low %v2082_v22, %v2114_v28  ;;  %v2134_v55 = vcombine.high %v2082_v22, %v2114_v28  ;;  %v2137_v56 = vcombine.low %v3529_v25, %v2130_v45  ;;  %v2366_v22 = vld [vmem:[%s3730_s3 + $0x30] sm:$0xff] }
 0x39d   : > { %2308 = vrot.lane.b32.xlu1 %v2268_v48, %s3109_s9  ;;  %2304 = vrot.lane.b32.xlu0 %v2267_v49, %s3110_s14  ;;  %v2135_v57 = vcombine.low %v3532_v26, %v2123_v46  ;;  %v2271_v58 = vcombine.low %v3515_v17, %v3537_v38  ;;  %v2136_v61 = vcombine.high %v3532_v26, %v2123_v46  ;;  %v3117_v13 = vmov 0.0|0.0   ;;  %s2450_s14 = scalar_lea.sflag [#allocation8], %s3269_s28 }
 0x39e   : > { %v2273_v62 = vcombine.low %v3518_v18, %v3540_v43  ;;  %v2138_v1 = vcombine.high %v3529_v25, %v2130_v45  ;;  %v2272_v8 = vcombine.high %v3515_v17, %v3537_v38  ;;  %v2274_v9 = vcombine.high %v3518_v18, %v3540_v43  ;;  %2823 = vmatprep.subr.bf16.mxu1 %v3117_v13  ;;  %v2364_v18 = vld [vmem:[%s3730_s3 + $0x20] sm:$0xff] }
 0x39f   : > { %v2131_v10 = vcombine.low %v3523_v21, %v3543_v44  ;;  %v2824_v14 = vpack.c.bf16 %v2361_v12, %v2360_v11  ;;  %v2827_v17 = vpack.c.bf16 %v2363_v16, %v2362_v15  ;;  %v2830_v20 = vpack.c.bf16 %v2365_v19, %v2364_v18 }
 0x3a0   : > { %v2833_v24 = vpack.c.bf16 %v2367_v23, %v2366_v22  ;;  %v3125_v25 = vmov 0.0  }
 0x3a1   : > { %2316 = vrot.lane.b32.xlu1 %v2270_v50, %s3111_s30  ;;  %2276 = vrot.lane.b32.xlu0 %v2132_v35, %s3112_s16 }
 0x3a2   : > { %2825 = vmatpush3.bf16.msra.mxu1 %v2824_v14  ;;  %2808 = vmatprep.mubr.msk.f32.mxu1 %vm3124_vm4, %v3125_v25  ;;  %vm2357_vm4 = vcmask 523264  }
 0x3a3   : > { %2826 = vmatprep.subr.bf16.mxu1 %v3117_v13 }
 0x3a5   : > { %2280 = vrot.lane.b32.xlu1 %v2133_v47, %s3113_s17  ;;  %2312 = vrot.lane.b32.xlu0 %v2269_v29, %s3114_s24  ;;  %s3127_s24 = smov [#allocation7]  }
 0x3a6   : > { %2828 = vmatpush3.bf16.msra.mxu1 %v2827_v17 }
 0x3a7   : > { %2829 = vmatprep.subr.bf16.mxu1 %v3117_v13 }
 0x3a9   : > { %2284 = vrot.lane.b32.xlu1 %v2134_v55, %s3115_s12  ;;  %2296 = vrot.lane.b32.xlu0 %v2137_v56, %s3734_s13  ;;  %s3123_s13 = smov 52  }
 0x3aa   : > { %2831 = vmatpush3.bf16.msra.mxu1 %v2830_v20 }
 0x3ab   : > { %2832 = vmatprep.subr.bf16.mxu1 %v3117_v13 }
 0x3ad   : > { %2288 = vrot.lane.b32.xlu1 %v2135_v57, %s3118_s10  ;;  %2320 = vrot.lane.b32.xlu0 %v2271_v58, %s3119_s11 }
 0x3ae   : > { %2834 = vmatpush3.bf16.msra.mxu1 %v2833_v24 }
 0x3b1   : > { %2292 = vrot.lane.b32.xlu1 %v2136_v61, %s3120_s15  ;;  %2328 = vrot.lane.b32.xlu0 %v2273_v62, %s3121_s25  ;;  %s3122_s25 = smov 28  }
 0x3b5   : > { %2300 = vrot.lane.b32.xlu1 %v2138_v1, %s3122_s25  ;;  %923 = vrot.lane.b32.xlu0 %v915_v59, %s3112_s16  ;;  %s3740_s16 = smov 24  }
 0x3b9   : > { %2324 = vrot.lane.b32.xlu1 %v2272_v8, %s3123_s13  ;;  %931 = vrot.lane.b32.xlu0 %v917_v60, %s3115_s12 }
 0x3bd   : > { %2332 = vrot.lane.b32.xlu1 %v2274_v9, %s3126_s27  ;;  %939 = vrot.lane.b32.xlu0 %v919_v33, %s3120_s15 }
 0x3c1   : > { %927 = vrot.lane.b32.xlu1 %v916_v0, %s3113_s17  ;;  %947 = vrot.lane.b32.xlu0 %v921_v6, %s3122_s25  ;;  %s2612_s17 = sshll.u32 %s3269_s28, 3  ;;  %s2990_s25 = sshll.u32 %s3127_s24, 4  ;;  %s2991_s25 = int_to_ptr.vmem [resolvable:$false] %s2990_s25 }
 0x3c2   : > { %s279_s12 = scalar_lea.vmem [#allocation7], %s2612_s17  ;;  %s2992_s13 = scalar_lea.vmem %s2991_s25, 256 }
 0x3c3   : > { %s2477_s9 = sshll.u32 %s279_s12, 4  ;;  %s2478_s9 = int_to_ptr.vmem [resolvable:$true] %s2477_s9 }
 0x3c4   : > { %s2986_s30 = scalar_lea.vmem %s2478_s9, 128  ;;  %p2993_p10 = scmp.lt.s32.totalorder %s2478_s9, %s2991_s25 }
 0x3c5   : > { %935 = vrot.lane.b32.xlu1 %v918_v5, %s3118_s10  ;;  %s2657_s10 = sshll.u32 %s3092_s21, 7  ;;  %p2987_p8 = scmp.ne.s32.totalorder %s2478_s9, %s2986_s30 }
 0x3c6   : > { %s3650_s11 = scalar_lea.hbm %s3732_s5, %s2657_s10  ;;  %p2994_p13 = scmp.lt.s32.totalorder %s2992_s13, %s2986_s30 }
 0x3c7   : > { %p2988_p11 = pnand %p2987_p8, %p3741_p9 }
 0x3c8   : > { %p2995_p1 = por %p2994_p13, %p2993_p10 }
 0x3c9   : > { %943 = vrot.lane.b32.xlu1 %v920_v7, %s3740_s16  ;;  %p2989_p0 = pneg %p2988_p11 }
 0x3cb   : > { %p2996_p3 = pnand %p2995_p1, %p2989_p0 }
 0x40f   : > { %v2309_v59 = vpop.permute.xlu1 %2308  ;;  %v2305_v60 = vpop.permute.xlu0 %2304 }
 0x413   : > { %v2317_v33 = vpop.permute.xlu1 %2316  ;;  %v2277_v26 = vpop.permute.xlu0 %2276 }
 0x414   : > { %v2335_v63 = vsel %vm586_vm3, %v2131_v10, %v2277_v26 }
 0x417   : > { %v2281_v52 = vpop.permute.xlu1 %2280  ;;  %v2313_v54 = vpop.permute.xlu0 %2312 }
 0x418   : > { %v2336_v2 = vsel %vm951_vm2, %v2335_v63, %v2281_v52 }
 0x41b   : > { %v2285_v0 = vpop.permute.xlu1 %2284  ;;  %v2297_v27 = vpop.permute.xlu0 %2296 }
 0x41c   : > { %v2337_v32 = vsel %vm953_vm5, %v2336_v2, %v2285_v0 }
 0x41f   : > { %v2289_v6 = vpop.permute.xlu1 %2288  ;;  %v2321_v30 = vpop.permute.xlu0 %2320 }
 0x420   : > { %v2338_v4 = vsel %vm322_vm0, %v2337_v32, %v2289_v6 }
 0x423   : > { %v2293_v5 = vpop.permute.xlu1 %2292  ;;  %v2329_v31 = vpop.permute.xlu0 %2328 }
 0x424   : > { %v2339_v7 = vsel %vm956_vm6, %v2338_v4, %v2293_v5 }
 0x425   : > { %v2340_v36 = vsel %vm958_vm7, %v2339_v7, %v2297_v27 }
 0x427   : > { %v2301_v34 = vpop.permute.xlu1 %2300  ;;  %v924_v40 = vpop.permute.xlu0 %923 }
 0x428   : > { %v2341_v21 = vsel %vm960_vm8, %v2340_v36, %v2301_v34  ;;  %v950_v49 = vsel %vm586_vm3, %v914_v3, %v924_v40 }
 0x429   : > { %v2342_v37 = vsel %vm456_vm1, %v2341_v21, %v2305_v60 }
 0x42a   : > { %v2344_v39 = vsel %vm2343_vm9, %v2342_v37, %v2309_v59 }
 0x42b   : > { %v2325_v41 = vpop.permute.xlu1 %2324  ;;  %v2346_v42 = vsel %vm2345_vm10, %v2344_v39, %v2313_v54  ;;  %v932_v46 = vpop.permute.xlu0 %931 }
 0x42c   : > { %v2348_v38 = vsel %vm2347_vm11, %v2346_v42, %v2317_v33 }
 0x42d   : > { %v2350_v43 = vsel %vm2349_vm12, %v2348_v38, %v2321_v30 }
 0x42e   : > { %v2352_v44 = vsel %vm2351_vm13, %v2350_v43, %v2325_v41 }
 0x42f   : > { %v2333_v28 = vpop.permute.xlu1 %2332  ;;  %v2354_v45 = vsel %vm2353_vm14, %v2352_v44, %v2329_v31  ;;  %v940_v35 = vpop.permute.xlu0 %939 }
 0x430   : > { %v2356_v48 = vsel %vm2355_vm15, %v2354_v45, %v2333_v28 }
 0x431   : > { %2358 = vst.msk [vmem:[#allocation2] sm:$0xff] %vm2357_vm4, %v2356_v48 }
 0x433   : > { %v928_v50 = vpop.permute.xlu1 %927  ;;  %v948_v3 = vpop.permute.xlu0 %947 }
 0x434   : > { %v952_v29 = vsel %vm951_vm2, %v950_v49, %v928_v50 }
 0x435   : > { %v954_v55 = vsel %vm953_vm5, %v952_v29, %v932_v46 }
 0x437   : > { %v936_v47 = vpop.permute.xlu1 %935 }
 0x438   : > { %v955_v56 = vsel %vm322_vm0, %v954_v55, %v936_v47  ;;  %v2359_v57 = vld [vmem:[#allocation2] sm:$0xff] }
 0x439   : > { %2809 = vmatmul.mubr.msk.f32.vlgmr.msra.gmra.mrb[12].mxu1 %vm2357_vm4, %v2359_v57  ;;  %v957_v53 = vsel %vm956_vm6, %v955_v56, %v940_v35 }
 0x43b   : > { %v944_v51 = vpop.permute.xlu1 %943 }
 0x43c   : > { %v959_v58 = vsel %vm958_vm7, %v957_v53, %v944_v51 }
 0x43d   : > { %v961_v61 = vsel %vm960_vm8, %v959_v58, %v948_v3 }
 0x43e   : > { %962 = vst.msk [vmem:[%s279_s12] sm:$0xff] %vm456_vm1, %v961_v61 }
 0x43f   : > { %2999 = shalt.err (!%p2996_p3)
}
 0x440   : > { %s3000_s27 = scalar_lea.hbm %s3650_s11, 128  ;;  %s3004_s15 = scalar_lea.hbm %s3732_s5, 256 }
 0x441   : > { %p3001_p4 = scmp.ne.s32.totalorder %s3650_s11, %s3000_s27  ;;  %p3005_p12 = scmp.lt.u32.totalorder %s3650_s11, %s3732_s5 }
 0x442   : > { %p3006_p2 = scmp.lt.u32.totalorder %s3004_s15, %s3000_s27  ;;  %p3008_p8 = scmp.lt.u32.totalorder %s3000_s27, %s3650_s11 }
 0x443   : > { %p3002_p6 = pnand %p3001_p4, %p3741_p9 }
 0x444   : > { %p3007_p5 = por %p3006_p2, %p3005_p12 }
 0x445   : > { %p3003_p7 = pneg %p3002_p6 }
 0x446   : > { %p3009_p11 = por %p3008_p8, %p3007_p5 }
 0x448   : > { %p3010_p0 = pnand %p3009_p11, %p3003_p7 }
 0x44a   : > { %3013 = shalt.err (!%p3010_p0)
}
 0x44b   : > { %2842 = dma.vmem_to_hbm [thread:$0]  (%p3741_p9), %s2478_s9, 128, %s3650_s11, %s2450_s14  }
 0x44c   : > { %s272_s30 = scalar_lea.vmem [#allocation6], %s2612_s17  ;;  %s3677_s12 = scalar_lea.hbm %s3731_s4, %s2657_s10 }
 0x44d   : > { %s2464_s25 = sshll.u32 %s272_s30, 4  ;;  %s2445_s27 = scalar_lea.sflag [#allocation5], %s3269_s28  ;;  %s3679_s25 = int_to_ptr.vmem [resolvable:$true] %s2464_s25 }
 0x44e   : > { %s3014_s11 = scalar_lea.vmem %s3679_s25, 128  ;;  %s3128_s21 = smov [#allocation6]  }
 0x44f   : > { %p3015_p10 = scmp.ne.s32.totalorder %s3679_s25, %s3014_s11  ;;  %s3018_s17 = sshll.u32 %s3128_s21, 4  ;;  %s3019_s17 = int_to_ptr.vmem [resolvable:$false] %s3018_s17 }
 0x450   : > { %s3020_s10 = scalar_lea.vmem %s3019_s17, 256  ;;  %p3021_p3 = scmp.lt.s32.totalorder %s3679_s25, %s3019_s17 }
 0x451   : > { %p3016_p13 = pnand %p3015_p10, %p3741_p9  ;;  %p3022_p4 = scmp.lt.s32.totalorder %s3020_s10, %s3014_s11 }
 0x453   : > { %p3017_p1 = pneg %p3016_p13  ;;  %p3023_p6 = por %p3022_p4, %p3021_p3 }
 0x455   : > { %p3024_p7 = pnand %p3023_p6, %p3017_p1 }
 0x50c   : > { %v2438_v62 = vpop.f32.mrb[12].mxu1 }
 0x50d   : > { %2443 = vst.msk [vmem:[%s272_s30] sm:$0xff] %vm322_vm0, %v2438_v62  ;;  %v2810_v1 = vpop.f32.mrb[13].mxu1 }
 0x50e   : > { %3027 = shalt.err (!%p3024_p7)
}
 0x50f   : > { %s3028_s28 = scalar_lea.hbm %s3677_s12, 128  ;;  %s3032_s15 = scalar_lea.hbm %s3731_s4, 256 }
 0x510   : > { %p3029_p12 = scmp.ne.s32.totalorder %s3677_s12, %s3028_s28  ;;  %p3033_p8 = scmp.lt.u32.totalorder %s3677_s12, %s3731_s4 }
 0x511   : > { %p3034_p11 = scmp.lt.u32.totalorder %s3032_s15, %s3028_s28  ;;  %p3036_p10 = scmp.lt.u32.totalorder %s3028_s28, %s3677_s12 }
 0x512   : > { %p3030_p2 = pnand %p3029_p12, %p3741_p9 }
 0x513   : > { %p3035_p0 = por %p3034_p11, %p3033_p8 }
 0x514   : > { %p3031_p5 = pneg %p3030_p2 }
 0x515   : > { %p3037_p13 = por %p3036_p10, %p3035_p0 }
 0x517   : > { %p3038_p1 = pnand %p3037_p13, %p3031_p5 }
 0x519   : > { %3041 = shalt.err (!%p3038_p1)
}
 0x51a   : > { %2841 = dma.vmem_to_hbm [thread:$0]  (%p3741_p9), %s3679_s25, 128, %s3677_s12, %s2445_s27  }
 0x51b PF: > { %s2489_s30 = sand.u32 1, %s3080_s18   ;;  %p3742_p3 = scmp.ne.s32.totalorder %s3738_s8, 0 }
 0x51c   : > { %p3743_p4 = scmp.ge.s32.totalorder %s3100_s23, 2  ;;  %s2490_s13 = scalar_lea.sflag [#allocation5], %s2489_s30 }
 0x51e   : > { %p2850_p6 = pnand %p3743_p4, %p3742_p3 }
 0x520   : > { %3071 = dma.done.wait (!%p2850_p6), %s2490_s13, 128  }
 0x521   : > { %3073 = vsyncadd (!%p2850_p6), %s2490_s13, 4294967168  ;;  %s2499_s16 = scalar_lea.sflag [#allocation8], %s2489_s30 }
 0x522   : > { %3075 = dma.done.wait (!%p2850_p6), %s2499_s16, 128  }
 0x523   : > { %3077 = vsyncadd (!%p2850_p6), %s2499_s16, 4294967168  ;;  %s25_s23 = sadd.s32 1, %s3100_s23   ;;  %s3744_s18 = smov %s3084_s19 }
 0x524   : > { %p22_p7 = scmp.ge.s32.totalorder %s25_s23, 4   ;;  %s3745_s19 = smov %s3088_s20 }
 0x525   : > { %s3746_s20 = smov %s3215_s7  ;;  %s3747_s21 = smov %s3096_s22 }
 0x526   : > { %s3748_s22 = smov %s3750_s26  ;;  %24 = sbr.rel (!%p22_p7) target bundleno = 8 (0x8), region = 105 }
 0x52d   :  { %2504 = vsyncpa [#allocation4], 1 }
 0x52e   :  { %2506 = vsyncpa [#allocation4 + $0x1], 1 }
 0x52f   :  { %2507 = vsyncpa [#allocation5], 1 }
 0x530   :  { %2509 = vsyncpa [#allocation5 + $0x1], 1 }
 0x531   :  { %2510 = vsyncpa [#allocation8], 1 }
 0x532   :  { %2512 = vsyncpa [#allocation8 + $0x1], 1 }

</bundles_post_ra>
